<compile_context>
chip_gen: v7x
topology: tpu7x:2x2x1
jax: 0.10.0
libtpu: 0.0.40
codegen_flags: <defaults>
</compile_context>

<pallas_src>
import math

import jax
import jax.numpy as jnp
from jax.experimental import pallas as pl
from jax.experimental.pallas import tpu as pltpu

# (kernel_size, stride, Cin, Cout, L_out) per conv layer, for L_in = 32.
_LAYER_CFG = (
    (3, 2, 1,   64,  15),
    (2, 1, 64,  128, 14),
    (3, 2, 128, 128, 6),
    (2, 1, 128, 256, 5),
    (3, 1, 256, 256, 3),
    (3, 1, 256, 512, 1),
)
_L_IN = 32
_EPS = 1e-5

# im2col weight row counts after padding (layer1: K*Cin 3->16, Cout 64->128;
# layer2: Cin 64->128 to match the padded y1).
_W_ROWS = (16, 256, 384, 256, 768, 768)
# wA = [W1;W2;W3] (lane width 128), wB = [W4;W5] (256), wC = [W6] (512).
_A1 = (0, 16)
_A2 = (16, 272)
_A3 = (272, 656)
_B4 = (0, 256)
_B5 = (256, 1024)


def _conv_block(x_bf16, w_bf16, scale, shift, alpha):
    """One fused conv layer: im2col-matmul + folded bias/BN + PReLU."""
    acc = jnp.dot(x_bf16, w_bf16, preferred_element_type=jnp.float32)
    y = acc * scale + shift
    return jnp.where(y > 0.0, y, alpha * y)


def net2_kernel(x1_ref, wA_ref, wB_ref, wC_ref, vecs_ref, scal_ref,
                o_ref, y2_ref):
    def sc(i, c):  # (scale, shift) rows for layer i, sliced to c channels
        return (vecs_ref[2 * i:2 * i + 1, 0:c],
                vecs_ref[2 * i + 1:2 * i + 2, 0:c])

    # ---- layer 1: Conv1d(1, 64, k=3, s=2) (Cout zero-padded to 128) ----
    s, t = sc(0, 128)
    h1 = _conv_block(x1_ref[...], wA_ref[_A1[0]:_A1[1], :], s, t,
                     scal_ref[0])                                    # (15,128)

    # ---- layer 2: Conv1d(64, 128, k=2, s=1) ----
    x2 = jnp.concatenate([h1[0:14, :], h1[1:15, :]],
                         axis=1).astype(jnp.bfloat16)                # (14,256)
    s, t = sc(1, 128)
    y2_ref[...] = _conv_block(x2, wA_ref[_A2[0]:_A2[1], :], s, t,
                              scal_ref[1])                           # (14,128)

    # ---- layer 3: Conv1d(128, 128, k=3, s=2) — stride-2 taps from scratch ----
    x3 = jnp.concatenate([y2_ref[pl.ds(k, 6, 2), :] for k in range(3)],
                         axis=1).astype(jnp.bfloat16)                # (6,384)
    s, t = sc(2, 128)
    h3 = _conv_block(x3, wA_ref[_A3[0]:_A3[1], :], s, t, scal_ref[2])  # (6,128)

    # ---- layer 4: Conv1d(128, 256, k=2, s=1) ----
    x4 = jnp.concatenate([h3[0:5, :], h3[1:6, :]],
                         axis=1).astype(jnp.bfloat16)                # (5,256)
    s, t = sc(3, 256)
    h4 = _conv_block(x4, wB_ref[_B4[0]:_B4[1], :], s, t, scal_ref[3])  # (5,256)

    # ---- layer 5: Conv1d(256, 256, k=3, s=1) ----
    x5 = jnp.concatenate([h4[0:3, :], h4[1:4, :], h4[2:5, :]],
                         axis=1).astype(jnp.bfloat16)                # (3,768)
    s, t = sc(4, 256)
    h5 = _conv_block(x5, wB_ref[_B5[0]:_B5[1], :], s, t, scal_ref[4])  # (3,256)

    # ---- layer 6: Conv1d(256, 512, k=3, s=1), no BN ----
    x6 = jnp.concatenate([h5[0:1, :], h5[1:2, :], h5[2:3, :]],
                         axis=1).astype(jnp.bfloat16)                # (1,768)
    s, t = sc(5, 512)
    h6 = _conv_block(x6, wC_ref[...], s, t, scal_ref[5])             # (1,512)

    # ---- final Linear(512, 1): VPU multiply + lane reduce (MXU-free) ----
    # h6 == x.view(1, -1) because the last conv's L_out is 1 (channel order).
    wo = vecs_ref[12:13, :]                                          # (1,512)
    o_ref[...] = jnp.sum(h6 * wo, axis=1, keepdims=True) + scal_ref[6]


@jax.jit
def net2_forward(x, wA, wB, wC, vecs, scal):
    # x: (1, 1, 32) float32 (PyTorch NCL).  Build layer-1's stride-2 im2col
    # here (tiny, free) so the kernel sees a lane-padded (15, 16) bf16 tile.
    xs = x.reshape(-1)
    idx = 2 * jnp.arange(15)[:, None] + jnp.arange(3)[None, :]       # (15, 3)
    x1 = jnp.pad(xs[idx], ((0, 0), (0, 13))).astype(jnp.bfloat16)    # (15, 16)
    return pl.pallas_call(
        net2_kernel,
        out_shape=jax.ShapeDtypeStruct((1, 1), jnp.float32),
        in_specs=[pl.BlockSpec(memory_space=pltpu.MemorySpace.VMEM)] * 5
                 + [pl.BlockSpec(memory_space=pltpu.MemorySpace.SMEM)],
        out_specs=pl.BlockSpec(memory_space=pltpu.MemorySpace.VMEM),
        scratch_shapes=[pltpu.VMEM((14, 128), jnp.float32)],
    )(x1, wA, wB, wC, vecs, scal)


def init_params(key):
    """Deterministic synthetic parameters (PyTorch-style fan-in uniform)."""
    keys = jax.random.split(key, 40)
    k_iter = iter(keys)
    raw_convs = []
    flats, scale_rows, shift_rows = [], [], []
    for idx, (K, stride, cin, cout, lout) in enumerate(_LAYER_CFG):
        bound = 1.0 / math.sqrt(cin * K)
        w = jax.random.uniform(next(k_iter), (cout, cin, K), jnp.float32,
                               -bound, bound)
        b = jax.random.uniform(next(k_iter), (cout,), jnp.float32,
                               -bound, bound)
        # Quantize conv weights to bf16 once; kernel and reference share them.
        w_q = w.astype(jnp.bfloat16).astype(jnp.float32)
        if idx < 5:   # conv followed by BatchNorm1d (eval mode)
            gamma = jax.random.uniform(next(k_iter), (cout,), jnp.float32, 0.5, 1.5)
            beta  = jax.random.uniform(next(k_iter), (cout,), jnp.float32, -0.5, 0.5)
            rmean = jax.random.uniform(next(k_iter), (cout,), jnp.float32, -0.5, 0.5)
            rvar  = jax.random.uniform(next(k_iter), (cout,), jnp.float32, 0.5, 1.5)
            scale = gamma / jnp.sqrt(rvar + _EPS)
            shift = (b - rmean) * scale + beta
            bn = (gamma, beta, rmean, rvar)
        else:         # last conv: no BatchNorm
            scale = jnp.ones((cout,), jnp.float32)
            shift = b
            bn = None
        raw_convs.append((w_q, b, bn))

        # im2col weight: (K, Cin, Cout) -> (K*Cin, Cout) with padding.
        wf = jnp.transpose(w_q, (2, 1, 0))                   # (K, Cin, Cout)
        if idx == 0:
            wf = jnp.pad(wf, ((0, 0), (0, 0), (0, 64)))      # Cout 64 -> 128
            wf = wf.reshape(K * cin, 128)                    # (3, 128)
            wf = jnp.pad(wf, ((0, 16 - K * cin), (0, 0)))    # rows 3 -> 16
        elif idx == 1:
            wf = jnp.pad(wf, ((0, 0), (0, 64), (0, 0)))      # Cin 64 -> 128
            wf = wf.reshape(2 * 128, 128)                    # (256, 128)
        else:
            wf = wf.reshape(K * cin, cout)
        assert wf.shape[0] == _W_ROWS[idx], (idx, wf.shape)
        flats.append(wf)
        scale_rows.append(jnp.pad(scale, (0, 512 - scale.shape[0])))
        shift_rows.append(jnp.pad(shift, (0, 512 - shift.shape[0])))

    bound = 1.0 / math.sqrt(512)
    Wout = jax.random.uniform(next(k_iter), (1, 512), jnp.float32, -bound, bound)
    bout = jax.random.uniform(next(k_iter), (1,), jnp.float32, -bound, bound)
    alphas = jnp.full((6,), 0.25, jnp.float32)               # nn.PReLU default

    # Packed weight groups (bf16) by lane width — 3 DMAs instead of 6+.
    wA = jnp.concatenate(flats[0:3], axis=0).astype(jnp.bfloat16)   # (656, 128)
    wB = jnp.concatenate(flats[3:5], axis=0).astype(jnp.bfloat16)   # (1024, 256)
    wC = flats[5].astype(jnp.bfloat16)                              # (768, 512)

    # Packed per-channel table: rows 2i/2i+1 = scale/shift of layer i, row 12 = Wout.
    rows = []
    for s_row, h_row in zip(scale_rows, shift_rows):
        rows += [s_row, h_row]
    rows.append(Wout[0])
    vecs = jnp.stack(rows, axis=0)                                   # (13, 512)

    # SMEM scalars: 6 PReLU alphas, final bias, 1 pad.
    scal = jnp.concatenate([alphas, bout, jnp.zeros((1,), jnp.float32)])  # (8,)

    kernel_args = (wA, wB, wC, vecs, scal)
    raw = {"convs": raw_convs, "Wout": Wout, "bout": bout, "alphas": alphas}
    return kernel_args, raw


def ref_forward(x, raw):
    """Pure-JAX reference mirroring the PyTorch forward (BN in eval mode),
    computed in f32 with the same bf16-quantized conv weights the kernel uses."""
    h = x[0].T                                               # (32, 1) = (L, C)
    for i, (K, stride, cin, cout, lout) in enumerate(_LAYER_CFG):
        w, b, bn = raw["convs"][i]
        cols = jnp.stack([h[l * stride: l * stride + K, :] for l in range(lout)],
                         axis=0)                             # (L_out, K, Cin)
        h = jnp.einsum("lkc,ock->lo", cols, w, precision="highest") + b[None, :]
        if bn is not None:
            gamma, beta, rmean, rvar = bn
            h = (h - rmean[None, :]) / jnp.sqrt(rvar[None, :] + _EPS) \
                * gamma[None, :] + beta[None, :]
        a = raw["alphas"][i]
        h = jnp.where(h > 0, h, a * h)
    feat = h.reshape(1, -1)                                  # (1, 512)
    return jnp.dot(feat, raw["Wout"].T, precision="highest") + raw["bout"][None, :]


if __name__ == "__main__":
    key = jax.random.PRNGKey(0)
    kx, kp = jax.random.split(key)
    x = jax.random.normal(kx, (1, 1, _L_IN), jnp.float32)    # NCL, like PyTorch

    kernel_args, raw = init_params(kp)
    out = net2_forward(x, *kernel_args)
    out = jax.block_until_ready(out)

    ref = ref_forward(x, raw)
    assert out.shape == (1, 1), out.shape
    assert jnp.allclose(out, ref, rtol=2e-2, atol=2e-2), (out, ref)
    print("KERNEL_OK")
</pallas_src>

<mosaic_0001>
module attributes {stable_mosaic.version = 11 : i64} {
  func.func @net2_kernel(%arg0: memref<15x16xbf16, #tpu.memory_space<vmem>>, %arg1: memref<656x128xbf16, #tpu.memory_space<vmem>>, %arg2: memref<1024x256xbf16, #tpu.memory_space<vmem>>, %arg3: memref<768x512xbf16, #tpu.memory_space<vmem>>, %arg4: memref<13x512xf32, #tpu.memory_space<vmem>>, %arg5: memref<8xf32, #tpu.memory_space<smem>>, %arg6: memref<1x1xf32, #tpu.memory_space<vmem>>, %arg7: memref<14x128xf32, #tpu.memory_space<vmem>>) attributes {dimension_semantics = [], scalar_prefetch = 0 : i64, scratch_operands = 1 : i64, tpu.core_type = #tpu.core_type<tc>} {
    %c0 = arith.constant 0 : index
    %c0_0 = arith.constant 0 : index
    %0 = vector.load %arg4[%c0, %c0_0] : memref<13x512xf32, #tpu.memory_space<vmem>>, vector<1x128xf32>
    %c1 = arith.constant 1 : index
    %c0_1 = arith.constant 0 : index
    %1 = vector.load %arg4[%c1, %c0_1] : memref<13x512xf32, #tpu.memory_space<vmem>>, vector<1x128xf32>
    %c0_2 = arith.constant 0 : index
    %c0_3 = arith.constant 0 : index
    %2 = vector.load %arg0[%c0_2, %c0_3] : memref<15x16xbf16, #tpu.memory_space<vmem>>, vector<15x16xbf16>
    %c0_4 = arith.constant 0 : index
    %c0_5 = arith.constant 0 : index
    %3 = vector.load %arg1[%c0_4, %c0_5] : memref<656x128xbf16, #tpu.memory_space<vmem>>, vector<16x128xbf16>
    %c0_6 = arith.constant 0 : index
    %4 = memref.load %arg5[%c0_6] : memref<8xf32, #tpu.memory_space<smem>>
    %cst = arith.constant dense<0.000000e+00> : vector<15x128xf32>
    %5 = tpu.matmul %2, %3, %cst {dimension_numbers = #tpu.dot_dimension_numbers<[1], [0], [0], [1], [0, 0, 1, 1], [], []>} : vector<15x16xbf16>, vector<16x128xbf16>, vector<15x128xf32> -> vector<15x128xf32>
    %6 = vector.broadcast %0 : vector<1x128xf32> to vector<15x128xf32>
    %7 = arith.mulf %5, %6 : vector<15x128xf32>
    %8 = vector.broadcast %1 : vector<1x128xf32> to vector<15x128xf32>
    %9 = arith.addf %7, %8 : vector<15x128xf32>
    %cst_7 = arith.constant 0.000000e+00 : f32
    %10 = vector.broadcast %cst_7 : f32 to vector<15x128xf32>
    %11 = arith.cmpf ogt, %9, %10 : vector<15x128xf32>
    %12 = vector.broadcast %4 : f32 to vector<15x128xf32>
    %13 = arith.mulf %12, %9 : vector<15x128xf32>
    %14 = arith.select %11, %9, %13 : vector<15x128xi1>, vector<15x128xf32>
    %15 = vector.extract_strided_slice %14 {offsets = [0, 0], sizes = [14, 128], strides = [1, 1]} : vector<15x128xf32> to vector<14x128xf32>
    %16 = vector.extract_strided_slice %14 {offsets = [1, 0], sizes = [14, 128], strides = [1, 1]} : vector<15x128xf32> to vector<14x128xf32>
    %17 = tpu.concatenate %15, %16 in 1 : vector<14x128xf32>, vector<14x128xf32> -> vector<14x256xf32>
    %18 = arith.truncf %17 : vector<14x256xf32> to vector<14x256xbf16>
    %c2 = arith.constant 2 : index
    %c0_8 = arith.constant 0 : index
    %19 = vector.load %arg4[%c2, %c0_8] : memref<13x512xf32, #tpu.memory_space<vmem>>, vector<1x128xf32>
    %c3 = arith.constant 3 : index
    %c0_9 = arith.constant 0 : index
    %20 = vector.load %arg4[%c3, %c0_9] : memref<13x512xf32, #tpu.memory_space<vmem>>, vector<1x128xf32>
    %c16 = arith.constant 16 : index
    %c0_10 = arith.constant 0 : index
    %21 = vector.load %arg1[%c16, %c0_10] : memref<656x128xbf16, #tpu.memory_space<vmem>>, vector<256x128xbf16>
    %c1_11 = arith.constant 1 : index
    %22 = memref.load %arg5[%c1_11] : memref<8xf32, #tpu.memory_space<smem>>
    %cst_12 = arith.constant dense<0.000000e+00> : vector<14x128xf32>
    %23 = tpu.matmul %18, %21, %cst_12 {dimension_numbers = #tpu.dot_dimension_numbers<[1], [0], [0], [1], [0, 0, 1, 1], [], []>} : vector<14x256xbf16>, vector<256x128xbf16>, vector<14x128xf32> -> vector<14x128xf32>
    %24 = vector.broadcast %19 : vector<1x128xf32> to vector<14x128xf32>
    %25 = arith.mulf %23, %24 : vector<14x128xf32>
    %26 = vector.broadcast %20 : vector<1x128xf32> to vector<14x128xf32>
    %27 = arith.addf %25, %26 : vector<14x128xf32>
    %cst_13 = arith.constant 0.000000e+00 : f32
    %28 = vector.broadcast %cst_13 : f32 to vector<14x128xf32>
    %29 = arith.cmpf ogt, %27, %28 : vector<14x128xf32>
    %30 = vector.broadcast %22 : f32 to vector<14x128xf32>
    %31 = arith.mulf %30, %27 : vector<14x128xf32>
    %32 = arith.select %29, %27, %31 : vector<14x128xi1>, vector<14x128xf32>
    %c0_14 = arith.constant 0 : index
    %c0_15 = arith.constant 0 : index
    %33 = vector.load %arg7[%c0_14, %c0_15] : memref<14x128xf32, #tpu.memory_space<vmem>>, vector<14x128xf32>
    tpu.vector_store %arg7[%c0_14, %c0_15], %32 {strides = array<i32>} : memref<14x128xf32, #tpu.memory_space<vmem>>, vector<14x128xf32>,
    %c0_16 = arith.constant 0 : index
    %c0_17 = arith.constant 0 : index
    %34 = tpu.strided_load %arg7[%c0_16, %c0_17] {strides = array<i32: 2, 1>} : memref<14x128xf32, #tpu.memory_space<vmem>>, vector<6x128xf32>
    %c1_18 = arith.constant 1 : index
    %c0_19 = arith.constant 0 : index
    %35 = tpu.strided_load %arg7[%c1_18, %c0_19] {strides = array<i32: 2, 1>} : memref<14x128xf32, #tpu.memory_space<vmem>>, vector<6x128xf32>
    %c2_20 = arith.constant 2 : index
    %c0_21 = arith.constant 0 : index
    %36 = tpu.strided_load %arg7[%c2_20, %c0_21] {strides = array<i32: 2, 1>} : memref<14x128xf32, #tpu.memory_space<vmem>>, vector<6x128xf32>
    %37 = tpu.concatenate %34, %35, %36 in 1 : vector<6x128xf32>, vector<6x128xf32>, vector<6x128xf32> -> vector<6x384xf32>
    %38 = arith.truncf %37 : vector<6x384xf32> to vector<6x384xbf16>
    %c4 = arith.constant 4 : index
    %c0_22 = arith.constant 0 : index
    %39 = vector.load %arg4[%c4, %c0_22] : memref<13x512xf32, #tpu.memory_space<vmem>>, vector<1x128xf32>
    %c5 = arith.constant 5 : index
    %c0_23 = arith.constant 0 : index
    %40 = vector.load %arg4[%c5, %c0_23] : memref<13x512xf32, #tpu.memory_space<vmem>>, vector<1x128xf32>
    %c272 = arith.constant 272 : index
    %c0_24 = arith.constant 0 : index
    %41 = vector.load %arg1[%c272, %c0_24] : memref<656x128xbf16, #tpu.memory_space<vmem>>, vector<384x128xbf16>
    %c2_25 = arith.constant 2 : index
    %42 = memref.load %arg5[%c2_25] : memref<8xf32, #tpu.memory_space<smem>>
    %cst_26 = arith.constant dense<0.000000e+00> : vector<6x128xf32>
    %43 = tpu.matmul %38, %41, %cst_26 {dimension_numbers = #tpu.dot_dimension_numbers<[1], [0], [0], [1], [0, 0, 1, 1], [], []>} : vector<6x384xbf16>, vector<384x128xbf16>, vector<6x128xf32> -> vector<6x128xf32>
    %44 = vector.broadcast %39 : vector<1x128xf32> to vector<6x128xf32>
    %45 = arith.mulf %43, %44 : vector<6x128xf32>
    %46 = vector.broadcast %40 : vector<1x128xf32> to vector<6x128xf32>
    %47 = arith.addf %45, %46 : vector<6x128xf32>
    %cst_27 = arith.constant 0.000000e+00 : f32
    %48 = vector.broadcast %cst_27 : f32 to vector<6x128xf32>
    %49 = arith.cmpf ogt, %47, %48 : vector<6x128xf32>
    %50 = vector.broadcast %42 : f32 to vector<6x128xf32>
    %51 = arith.mulf %50, %47 : vector<6x128xf32>
    %52 = arith.select %49, %47, %51 : vector<6x128xi1>, vector<6x128xf32>
    %53 = vector.extract_strided_slice %52 {offsets = [0, 0], sizes = [5, 128], strides = [1, 1]} : vector<6x128xf32> to vector<5x128xf32>
    %54 = vector.extract_strided_slice %52 {offsets = [1, 0], sizes = [5, 128], strides = [1, 1]} : vector<6x128xf32> to vector<5x128xf32>
    %55 = tpu.concatenate %53, %54 in 1 : vector<5x128xf32>, vector<5x128xf32> -> vector<5x256xf32>
    %56 = arith.truncf %55 : vector<5x256xf32> to vector<5x256xbf16>
    %c6 = arith.constant 6 : index
    %c0_28 = arith.constant 0 : index
    %57 = vector.load %arg4[%c6, %c0_28] : memref<13x512xf32, #tpu.memory_space<vmem>>, vector<1x256xf32>
    %c7 = arith.constant 7 : index
    %c0_29 = arith.constant 0 : index
    %58 = vector.load %arg4[%c7, %c0_29] : memref<13x512xf32, #tpu.memory_space<vmem>>, vector<1x256xf32>
    %c0_30 = arith.constant 0 : index
    %c0_31 = arith.constant 0 : index
    %59 = vector.load %arg2[%c0_30, %c0_31] : memref<1024x256xbf16, #tpu.memory_space<vmem>>, vector<256x256xbf16>
    %c3_32 = arith.constant 3 : index
    %60 = memref.load %arg5[%c3_32] : memref<8xf32, #tpu.memory_space<smem>>
    %cst_33 = arith.constant dense<0.000000e+00> : vector<5x256xf32>
    %61 = tpu.matmul %56, %59, %cst_33 {dimension_numbers = #tpu.dot_dimension_numbers<[1], [0], [0], [1], [0, 0, 1, 1], [], []>} : vector<5x256xbf16>, vector<256x256xbf16>, vector<5x256xf32> -> vector<5x256xf32>
    %62 = vector.broadcast %57 : vector<1x256xf32> to vector<5x256xf32>
    %63 = arith.mulf %61, %62 : vector<5x256xf32>
    %64 = vector.broadcast %58 : vector<1x256xf32> to vector<5x256xf32>
    %65 = arith.addf %63, %64 : vector<5x256xf32>
    %cst_34 = arith.constant 0.000000e+00 : f32
    %66 = vector.broadcast %cst_34 : f32 to vector<5x256xf32>
    %67 = arith.cmpf ogt, %65, %66 : vector<5x256xf32>
    %68 = vector.broadcast %60 : f32 to vector<5x256xf32>
    %69 = arith.mulf %68, %65 : vector<5x256xf32>
    %70 = arith.select %67, %65, %69 : vector<5x256xi1>, vector<5x256xf32>
    %71 = vector.extract_strided_slice %70 {offsets = [0, 0], sizes = [3, 256], strides = [1, 1]} : vector<5x256xf32> to vector<3x256xf32>
    %72 = vector.extract_strided_slice %70 {offsets = [1, 0], sizes = [3, 256], strides = [1, 1]} : vector<5x256xf32> to vector<3x256xf32>
    %73 = vector.extract_strided_slice %70 {offsets = [2, 0], sizes = [3, 256], strides = [1, 1]} : vector<5x256xf32> to vector<3x256xf32>
    %74 = tpu.concatenate %71, %72, %73 in 1 : vector<3x256xf32>, vector<3x256xf32>, vector<3x256xf32> -> vector<3x768xf32>
    %75 = arith.truncf %74 : vector<3x768xf32> to vector<3x768xbf16>
    %c8 = arith.constant 8 : index
    %c0_35 = arith.constant 0 : index
    %76 = vector.load %arg4[%c8, %c0_35] : memref<13x512xf32, #tpu.memory_space<vmem>>, vector<1x256xf32>
    %c9 = arith.constant 9 : index
    %c0_36 = arith.constant 0 : index
    %77 = vector.load %arg4[%c9, %c0_36] : memref<13x512xf32, #tpu.memory_space<vmem>>, vector<1x256xf32>
    %c256 = arith.constant 256 : index
    %c0_37 = arith.constant 0 : index
    %78 = vector.load %arg2[%c256, %c0_37] : memref<1024x256xbf16, #tpu.memory_space<vmem>>, vector<768x256xbf16>
    %c4_38 = arith.constant 4 : index
    %79 = memref.load %arg5[%c4_38] : memref<8xf32, #tpu.memory_space<smem>>
    %cst_39 = arith.constant dense<0.000000e+00> : vector<3x256xf32>
    %80 = tpu.matmul %75, %78, %cst_39 {dimension_numbers = #tpu.dot_dimension_numbers<[1], [0], [0], [1], [0, 0, 1, 1], [], []>} : vector<3x768xbf16>, vector<768x256xbf16>, vector<3x256xf32> -> vector<3x256xf32>
    %81 = vector.broadcast %76 : vector<1x256xf32> to vector<3x256xf32>
    %82 = arith.mulf %80, %81 : vector<3x256xf32>
    %83 = vector.broadcast %77 : vector<1x256xf32> to vector<3x256xf32>
    %84 = arith.addf %82, %83 : vector<3x256xf32>
    %cst_40 = arith.constant 0.000000e+00 : f32
    %85 = vector.broadcast %cst_40 : f32 to vector<3x256xf32>
    %86 = arith.cmpf ogt, %84, %85 : vector<3x256xf32>
    %87 = vector.broadcast %79 : f32 to vector<3x256xf32>
    %88 = arith.mulf %87, %84 : vector<3x256xf32>
    %89 = arith.select %86, %84, %88 : vector<3x256xi1>, vector<3x256xf32>
    %90 = vector.extract_strided_slice %89 {offsets = [0, 0], sizes = [1, 256], strides = [1, 1]} : vector<3x256xf32> to vector<1x256xf32>
    %91 = vector.extract_strided_slice %89 {offsets = [1, 0], sizes = [1, 256], strides = [1, 1]} : vector<3x256xf32> to vector<1x256xf32>
    %92 = vector.extract_strided_slice %89 {offsets = [2, 0], sizes = [1, 256], strides = [1, 1]} : vector<3x256xf32> to vector<1x256xf32>
    %93 = tpu.concatenate %90, %91, %92 in 1 : vector<1x256xf32>, vector<1x256xf32>, vector<1x256xf32> -> vector<1x768xf32>
    %94 = arith.truncf %93 : vector<1x768xf32> to vector<1x768xbf16>
    %c10 = arith.constant 10 : index
    %c0_41 = arith.constant 0 : index
    %95 = vector.load %arg4[%c10, %c0_41] : memref<13x512xf32, #tpu.memory_space<vmem>>, vector<1x512xf32>
    %c11 = arith.constant 11 : index
    %c0_42 = arith.constant 0 : index
    %96 = vector.load %arg4[%c11, %c0_42] : memref<13x512xf32, #tpu.memory_space<vmem>>, vector<1x512xf32>
    %c0_43 = arith.constant 0 : index
    %c0_44 = arith.constant 0 : index
    %97 = vector.load %arg3[%c0_43, %c0_44] : memref<768x512xbf16, #tpu.memory_space<vmem>>, vector<768x512xbf16>
    %c5_45 = arith.constant 5 : index
    %98 = memref.load %arg5[%c5_45] : memref<8xf32, #tpu.memory_space<smem>>
    %cst_46 = arith.constant dense<0.000000e+00> : vector<1x512xf32>
    %99 = tpu.matmul %94, %97, %cst_46 {dimension_numbers = #tpu.dot_dimension_numbers<[1], [0], [0], [1], [0, 0, 1, 1], [], []>} : vector<1x768xbf16>, vector<768x512xbf16>, vector<1x512xf32> -> vector<1x512xf32>
    %100 = arith.mulf %99, %95 : vector<1x512xf32>
    %101 = arith.addf %100, %96 : vector<1x512xf32>
    %cst_47 = arith.constant 0.000000e+00 : f32
    %102 = vector.broadcast %cst_47 : f32 to vector<1x512xf32>
    %103 = arith.cmpf ogt, %101, %102 : vector<1x512xf32>
    %104 = vector.broadcast %98 : f32 to vector<1x512xf32>
    %105 = arith.mulf %104, %101 : vector<1x512xf32>
    %106 = arith.select %103, %101, %105 : vector<1x512xi1>, vector<1x512xf32>
    %c12 = arith.constant 12 : index
    %c0_48 = arith.constant 0 : index
    %107 = vector.load %arg4[%c12, %c0_48] : memref<13x512xf32, #tpu.memory_space<vmem>>, vector<1x512xf32>
    %108 = arith.mulf %106, %107 : vector<1x512xf32>
    %cst_49 = arith.constant dense<0.000000e+00> : vector<1xf32>
    %109 = vector.multi_reduction <add>, %108, %cst_49 [1] : vector<1x512xf32> to vector<1xf32>
    %110 = vector.shape_cast %109 : vector<1xf32> to vector<1x1xf32>
    %c6_50 = arith.constant 6 : index
    %111 = memref.load %arg5[%c6_50] : memref<8xf32, #tpu.memory_space<smem>>
    %112 = vector.broadcast %111 : f32 to vector<1x1xf32>
    %113 = arith.addf %110, %112 : vector<1x1xf32>
    %c0_51 = arith.constant 0 : index
    %c0_52 = arith.constant 0 : index
    %114 = vector.load %arg6[%c0_51, %c0_52] : memref<1x1xf32, #tpu.memory_space<vmem>>, vector<1x1xf32>
    tpu.vector_store %arg6[%c0_51, %c0_52], %113 {strides = array<i32>} : memref<1x1xf32, #tpu.memory_space<vmem>>, vector<1x1xf32>,
    return
  }
}

</mosaic_0001>

<bundles_post_ra>
// kernel: net2_forward.1
= control target key start
LH: loop header
LB: loop body
LE: loop exit
PB: predicated region body
PF: predicated region fallthrough
CT: control target
= control target key end

     0   :  { %11 = vsyncpa [#allocation5], 0  ;;  %s5441_s0 = inlined_call_operand.vmem [shape: bf16[15,16], index: 0, kind: input, shape index: {}]   ;;  %s5442_s1 = inlined_call_operand.vmem [shape: bf16[656,128], index: 1, kind: input, shape index: {}]   ;;  %s5443_s2 = inlined_call_operand.vmem [shape: bf16[1024,256], index: 2, kind: input, shape index: {}]   ;;  %s5444_s3 = inlined_call_operand.vmem [shape: bf16[768,512], index: 3, kind: input, shape index: {}]   ;;  %s5445_s4 = inlined_call_operand.vmem [shape: f32[13,512], index: 4, kind: input, shape index: {}]   ;;  %s5446_s5 = inlined_call_operand.vmem [shape: f32[8], index: 5, kind: input, shape index: {}]   ;;  %s5447_s6 = inlined_call_operand.hbm [shape: f32[1,1], index: 6, kind: output, shape index: {}]  }
   0x1   :  { %12 = vsyncpa [#allocation4], 0  ;;  %s29_s23 = sshll.u32 %s5446_s5, 4  ;;  %s30_s23 = int_to_ptr.vmem [resolvable:$true] %s29_s23 }
   0x2   :  { %s4169_s24 = scalar_lea.vmem %s30_s23, 16  ;;  %p4174_p1 = scmp.lt.s32.totalorder %s30_s23, %s30_s23 }
   0x3   :  { %p4170_p0 = scmp.ne.s32.totalorder %s30_s23, %s4169_s24  ;;  %p4175_p2 = scmp.lt.s32.totalorder %s4169_s24, %s4169_s24 }
   0x5   :  { %p4176_p3 = por %p4175_p2, %p4174_p1 }
   0x7   :  { %p4177_p4 = pnand %p4176_p3, %p4170_p0 }
   0x9   :  { %4180 = shalt.err (!%p4177_p4)
}
   0xa   :  { %s4207_s25 = smov [#allocation3]  }
   0xb   :  { %32 = dma.vmem_to_smem %s30_s23, 16, %s4207_s25, [#allocation5]  }
   0xc   :  { %4203 = dma.done.wait [#allocation5], 16  }
   0xd   :  { %4204 = vsyncadd [#allocation5], 4294967280 }
   0xe   :  { %36 = sfence }
   0xf   :  { %v3647_v0 = vld [vmem:[%s5442_s1] sm:$0xff]   ;;  %v4208_v1 = vmov 0.0   ;;  %vm4209_vm0 = vmmov 0   ;;  %vm56_vm1 = vcmask 130048   ;;  %v3649_v3 = vld [vmem:[%s5442_s1 + $0x48] sm:$0xff]   ;;  %v3651_v5 = vld [vmem:[%s5442_s1 + $0x50] sm:$0xff]  }
  0x10   :  { %3595 = vmatprep.subr.bf16.mxu0 %v4208_v1  ;;  %v3648_v2 = vld [vmem:[%s5441_s0] sm:$0xff]   ;;  %3597 = vmatprep.mubr.msk.bf16.mxu0 %vm4209_vm0, %v4208_v1  ;;  %v3650_v4 = vld [vmem:[%s5442_s1 + $0x8] sm:$0xff]   ;;  %v3652_v6 = vld [vmem:[%s5442_s1 + $0x10] sm:$0xff]   ;;  %s44_s18 = sld [smem:[#allocation3]]  ;;  %vm114_vm4 = vcmask 1046528   ;;  %s3167_s13 = sld [smem:[#allocation3 + $0x1]] }
  0x11   :  { %3596 = vmatpush3.bf16.msra.mxu0 %v3647_v0  ;;  %3542 = vmatprep.subr.bf16.mxu1 %v3649_v3  ;;  %v3653_v7 = vld [vmem:[%s5442_s1 + $0x58] sm:$0xff]   ;;  %v3655_v9 = vld [vmem:[%s5442_s1 + $0x60] sm:$0xff]   ;;  %v3657_v11 = vld [vmem:[%s5442_s1 + $0x68] sm:$0xff]   ;;  %s3184_s25 = sld [smem:[#allocation3 + $0x2]]  ;;  %s3211_s27 = sld [smem:[#allocation3 + $0x3]] }
  0x12   :  { %3543 = vmatpush3.bf16.msra.mxu1 %v3650_v4  ;;  %v3654_v8 = vld [vmem:[%s5442_s1 + $0x18] sm:$0xff]   ;;  %v3656_v10 = vld [vmem:[%s5442_s1 + $0x20] sm:$0xff]   ;;  %v3658_v12 = vld [vmem:[%s5442_s1 + $0x28] sm:$0xff]   ;;  %s3246_s7 = sld [smem:[#allocation3 + $0x4]]  ;;  %s3345_s11 = sld [smem:[#allocation3 + $0x5]] }
  0x13   :  { %3544 = vmatprep.subr.bf16.mxu1 %v3651_v5  ;;  %v3659_v13 = vld [vmem:[%s5442_s1 + $0x70] sm:$0xff]   ;;  %v3661_v15 = vld [vmem:[%s5442_s1 + $0x78] sm:$0xff]   ;;  %v3663_v17 = vld [vmem:[%s5442_s1 + $0x80] sm:$0xff]   ;;  %s4210_s15 = smov [#allocation6]  }
  0x14   :  { %3598 = vmatmul.mubr.msk.bf16.vlgmr.msra.gmra.mrb[0].mxu0 %vm56_vm1, %v3648_v2  ;;  %v3660_v14 = vld [vmem:[%s5442_s1 + $0x30] sm:$0xff]   ;;  %v3662_v16 = vld [vmem:[%s5442_s1 + $0x38] sm:$0xff]   ;;  %v3664_v18 = vld [vmem:[%s5442_s1 + $0x40] sm:$0xff]   ;;  %s3155_s16 = sshll.u32 %s4210_s15, 4  ;;  %vm3147_vm1 = vcmask 0   ;;  %s3156_s16 = int_to_ptr.vmem [resolvable:$true] %s3155_s16 }
  0x15   :  { %v3665_v19 = vld [vmem:[%s5442_s1 + $0xc8] sm:$0xff]   ;;  %v3668_v21 = vld [vmem:[%s5442_s1 + $0xd0] sm:$0xff]   ;;  %v38_v23 = vld [vmem:[%s5445_s4] ss:$0 sm:$0xff]  ;;  %s4181_s17 = scalar_lea.vmem %s3156_s16, 16  ;;  %p4186_p6 = scmp.lt.s32.totalorder %s3156_s16, %s3156_s16 }
  0x16   :  { %3545 = vmatpush3.bf16.msra.mxu1 %v3652_v6  ;;  %v3667_v20 = vld [vmem:[%s5442_s1 + $0x88] sm:$0xff]   ;;  %3564 = vmatprep.subr.bf16.mxu0 %v3665_v19  ;;  %v3670_v22 = vld [vmem:[%s5442_s1 + $0x90] sm:$0xff]   ;;  %v39_v24 = vld [vmem:[%s5445_s4 + $0x1] ss:$0 sm:$0xff]  ;;  %v107_v28 = vstv %s44_s18  ;;  %p4182_p5 = scmp.ne.s32.totalorder %s3156_s16, %s4181_s17 }
  0x17   :  { %3546 = vmatprep.subr.bf16.mxu1 %v3653_v7  ;;  %3565 = vmatpush3.bf16.msra.mxu0 %v3667_v20  ;;  %v3666_v43 = vld [vmem:[%s5442_s1 + $0x108] sm:$0xff]   ;;  %v3669_v44 = vld [vmem:[%s5442_s1 + $0x110] sm:$0xff]   ;;  %v3671_v45 = vld [vmem:[%s5442_s1 + $0xd8] sm:$0xff]  }
  0x18   :  { %3566 = vmatprep.subr.bf16.mxu0 %v3668_v21  ;;  %v3672_v46 = vld [vmem:[%s5442_s1 + $0x118] sm:$0xff]   ;;  %v3674_v48 = vld [vmem:[%s5442_s1 + $0xe0] sm:$0xff]   ;;  %v3677_v51 = vld [vmem:[%s5442_s1 + $0xe8] sm:$0xff]  }
  0x19   :  { %v3673_v47 = vld [vmem:[%s5442_s1 + $0x98] sm:$0xff]   ;;  %v3675_v49 = vld [vmem:[%s5442_s1 + $0x120] sm:$0xff]   ;;  %v3678_v52 = vld [vmem:[%s5442_s1 + $0x128] sm:$0xff]  }
  0x1a   :  { %3547 = vmatpush3.bf16.msra.mxu1 %v3654_v8  ;;  %v3676_v50 = vld [vmem:[%s5442_s1 + $0xa0] sm:$0xff]   ;;  %v3679_v53 = vld [vmem:[%s5442_s1 + $0xa8] sm:$0xff]   ;;  %v3680_v54 = vld [vmem:[%s5442_s1 + $0xf0] sm:$0xff]  }
  0x1b   :  { %3548 = vmatprep.subr.bf16.mxu1 %v3655_v9  ;;  %3567 = vmatpush3.bf16.msra.mxu0 %v3670_v22  ;;  %v3681_v55 = vld [vmem:[%s5442_s1 + $0x130] sm:$0xff]   ;;  %v3683_v57 = vld [vmem:[%s5442_s1 + $0xf8] sm:$0xff]   ;;  %v3686_v60 = vld [vmem:[%s5442_s1 + $0x100] sm:$0xff]   ;;  %v300_v9 = vstv %s3167_s13 }
  0x1c   :  { %3568 = vmatprep.subr.bf16.mxu0 %v3671_v45  ;;  %v3682_v56 = vld [vmem:[%s5442_s1 + $0xb0] sm:$0xff]   ;;  %v3684_v58 = vld [vmem:[%s5442_s1 + $0x138] sm:$0xff]   ;;  %v3687_v61 = vld [vmem:[%s5442_s1 + $0x140] sm:$0xff]  }
  0x1d   :  { %v3685_v59 = vld [vmem:[%s5442_s1 + $0xb8] sm:$0xff]   ;;  %v3688_v62 = vld [vmem:[%s5442_s1 + $0xc0] sm:$0xff]   ;;  %s4185_s1 = scalar_lea.vmem %s3156_s16, 32 }
  0x1e   :  { %3549 = vmatpush3.bf16.msra.mxu1 %v3656_v10  ;;  %v3691_v63 = vld [vmem:[%s5443_s2 + $0x4] ss:$8 sps:$4 sm:$0xff]   ;;  %v122_v2 = vld [vmem:[%s5445_s4 + $0x2] ss:$0 sm:$0xff]  ;;  %v123_v5 = vld [vmem:[%s5445_s4 + $0x3] ss:$0 sm:$0xff]  ;;  %p4187_p7 = scmp.lt.s32.totalorder %s4185_s1, %s4181_s17 }
  0x1f   :  { %3550 = vmatprep.subr.bf16.mxu1 %v3657_v11  ;;  %3569 = vmatpush3.bf16.msra.mxu0 %v3673_v47  ;;  %v3689_v22 = vld [vmem:[%s5443_s2] ss:$8 sps:$4 sm:$0xff]   ;;  %v3722_v45 = vld [vmem:[%s5443_s2 + $0xb0] ss:$8 sps:$4 sm:$0xff]  }
  0x20   :  { %3570 = vmatprep.subr.bf16.mxu0 %v3674_v48  ;;  %v3725_v47 = vld [vmem:[%s5443_s2 + $0xc0] ss:$8 sps:$4 sm:$0xff]   ;;  %v3730_v48 = vld [vmem:[%s5443_s2 + $0xd4] ss:$8 sps:$4 sm:$0xff]   ;;  %p4188_p8 = por %p4187_p7, %p4186_p6 }
  0x22   :  { %3551 = vmatpush3.bf16.msra.mxu1 %v3658_v12  ;;  %p4189_p9 = pnand %p4188_p8, %p4182_p5 }
  0x23   :  { %3552 = vmatprep.subr.bf16.mxu1 %v3659_v13  ;;  %3571 = vmatpush3.bf16.msra.mxu0 %v3676_v50  ;;  %v3731_v50 = vld [vmem:[%s5443_s2 + $0xe0] ss:$8 sps:$4 sm:$0xff]  }
  0x24   :  { %3572 = vmatprep.subr.bf16.mxu0 %v3677_v51  ;;  %v3733_v51 = vld [vmem:[%s5443_s2 + $0xe4] ss:$8 sps:$4 sm:$0xff]  }
  0x26   :  { %3553 = vmatpush3.bf16.msra.mxu1 %v3660_v14 }
  0x27   :  { %3554 = vmatprep.subr.bf16.mxu1 %v3661_v15  ;;  %3573 = vmatpush3.bf16.msra.mxu0 %v3679_v53  ;;  %v3734_v53 = vld [vmem:[%s5443_s2 + $0xf0] ss:$8 sps:$4 sm:$0xff]  }
  0x28   :  { %3574 = vmatprep.subr.bf16.mxu0 %v3680_v54  ;;  %v3739_v54 = vld [vmem:[%s5443_s2 + $0x104] ss:$8 sps:$4 sm:$0xff]  }
  0x2a   :  { %3555 = vmatpush3.bf16.msra.mxu1 %v3662_v16 }
  0x2b   :  { %3556 = vmatprep.subr.bf16.mxu1 %v3663_v17  ;;  %3575 = vmatpush3.bf16.msra.mxu0 %v3682_v56  ;;  %v3742_v56 = vld [vmem:[%s5443_s2 + $0x204] ss:$8 sps:$4 sm:$0xff]  }
  0x2c   :  { %3576 = vmatprep.subr.bf16.mxu0 %v3683_v57  ;;  %v3746_v57 = vld [vmem:[%s5443_s2 + $0x210] ss:$8 sps:$4 sm:$0xff]  }
  0x2e   :  { %3557 = vmatpush3.bf16.msra.mxu1 %v3664_v18 }
  0x2f   :  { %3601 = vmatprep.subr.bf16.mxu1 %v4208_v1  ;;  %3577 = vmatpush3.bf16.msra.mxu0 %v3685_v59  ;;  %v3752_v59 = vld [vmem:[%s5443_s2 + $0x220] ss:$8 sps:$4 sm:$0xff]  }
  0x30   :  { %3578 = vmatprep.subr.bf16.mxu0 %v3686_v60  ;;  %v3754_v60 = vld [vmem:[%s5443_s2 + $0x224] ss:$8 sps:$4 sm:$0xff]  }
  0x33   :  { %3579 = vmatpush3.bf16.msra.mxu0 %v3688_v62  ;;  %v3760_v62 = vld [vmem:[%s5443_s2 + $0x234] ss:$8 sps:$4 sm:$0xff]  }
  0x34   :  { %798 = vmatprep.subr.bf16.mxu0 %v3691_v63  ;;  %v3764_v63 = vld [vmem:[%s5443_s2 + $0x240] ss:$8 sps:$4 sm:$0xff]  }
  0xe7   :  { %v94_v25 = vpop.f32.mrb[0].mxu0 }
  0xe8   :  { %v101_v26 = vmul.f32 %v94_v25, %v38_v23  ;;  %v3599_v27 = vpop.f32.mrb[1].mxu0  ;;  %v3692_v25 = vld [vmem:[%s5443_s2 + $0x10] ss:$8 sps:$4 sm:$0xff]  }
  0xe9   :  { %v97_v29 = vpop.f32.mrb[2].mxu0  ;;  %v3695_v27 = vld [vmem:[%s5443_s2 + $0x20] ss:$8 sps:$4 sm:$0xff]  }
  0xea   :  { %v103_v30 = vadd.f32 %v101_v26, %v39_v24  ;;  %v102_v31 = vmul.f32 %v97_v29, %v38_v23  ;;  %v3600_v32 = vpop.f32.mrb[3].mxu0  ;;  %v3697_v26 = vld [vmem:[%s5443_s2 + $0x24] ss:$8 sps:$4 sm:$0xff]   ;;  %v3698_v29 = vld [vmem:[%s5443_s2 + $0x30] ss:$8 sps:$4 sm:$0xff]  }
  0xeb   :  { %v3706_v32 = vld [vmem:[%s5443_s2 + $0x54] ss:$8 sps:$4 sm:$0xff]  }
  0xec   :  { %vm105_vm2 = vcmp.gt.f32.partialorder %v103_v30, 0.0  ;;  %v108_v33 = vmul.f32 %v107_v28, %v103_v30  ;;  %v104_v34 = vadd.f32 %v102_v31, %v39_v24  ;;  %v3694_v24 = vld [vmem:[%s5443_s2 + $0x14] ss:$8 sps:$4 sm:$0xff]   ;;  %v3701_v31 = vld [vmem:[%s5443_s2 + $0x40] ss:$8 sps:$4 sm:$0xff]  }
  0xee   :  { %v109_v35 = vmul.f32 %v107_v28, %v104_v34  ;;  %vm106_vm3 = vcmp.gt.f32.partialorder %v104_v34, 0.0  ;;  %v110_v36 = vsel %vm105_vm2, %v103_v30, %v108_v33  ;;  %v3700_v28 = vld [vmem:[%s5443_s2 + $0x34] ss:$8 sps:$4 sm:$0xff]   ;;  %v3703_v30 = vld [vmem:[%s5443_s2 + $0x44] ss:$8 sps:$4 sm:$0xff]  }
  0xef   :  { %v115_v38 = vrot.slane %v110_v36, 1  ;;  %v3704_v33 = vld [vmem:[%s5443_s2 + $0x50] ss:$8 sps:$4 sm:$0xff]  }
  0xf0   :  { %v111_v37 = vsel %vm106_vm3, %v104_v34, %v109_v35  ;;  %v3709_v34 = vld [vmem:[%s5443_s2 + $0x64] ss:$8 sps:$4 sm:$0xff]   ;;  %v3707_v35 = vld [vmem:[%s5443_s2 + $0x60] ss:$8 sps:$4 sm:$0xff]  }
  0xf1   :  { %v116_v39 = vrot.slane %v111_v37, 1  ;;  %v120_v40 = vpack.c.bf16 %v111_v37, %v110_v36  ;;  %v3712_v36 = vld [vmem:[%s5443_s2 + $0x74] ss:$8 sps:$4 sm:$0xff]   ;;  %v3710_v37 = vld [vmem:[%s5443_s2 + $0x70] ss:$8 sps:$4 sm:$0xff]  }
  0xf3   :  { %v117_v41 = vsel %vm114_vm4, %v115_v38, %v116_v39  ;;  %v3715_v38 = vld [vmem:[%s5443_s2 + $0x84] ss:$8 sps:$4 sm:$0xff]  }
  0xf4   :  { %v121_v42 = vpack.c.bf16 %v116_v39, %v117_v41  ;;  %v3713_v39 = vld [vmem:[%s5443_s2 + $0x80] ss:$8 sps:$4 sm:$0xff]   ;;  %v3716_v41 = vld [vmem:[%s5443_s2 + $0x90] ss:$8 sps:$4 sm:$0xff]  }
  0xf6   :  { %285 = vmatprep.mubr.bf16.mxu1 %v121_v42  ;;  %v3721_v42 = vld [vmem:[%s5443_s2 + $0xa4] ss:$8 sps:$4 sm:$0xff]  }
  0xf7   :  { %286 = vmatmul.mubr.bf16.vlgmr.msra.gmra.mrb[0].mxu1 %v120_v40  ;;  %v3718_v40 = vld [vmem:[%s5443_s2 + $0x94] ss:$8 sps:$4 sm:$0xff]  }
  0xf8   :  { %3602 = vmatpush3.bf16.msra.mxu1 %v3666_v43  ;;  %3617 = vmatprep.mubr.msk.bf16.mxu1 %vm4209_vm0, %v4208_v1  ;;  %v3719_v43 = vld [vmem:[%s5443_s2 + $0xa0] ss:$8 sps:$4 sm:$0xff]   ;;  %vm3134_vm0 = vcmask 1040384  }
  0xf9   :  { %3603 = vmatprep.subr.bf16.mxu1 %v4208_v1 }
  0xfc   :  { %3604 = vmatpush3.bf16.msra.mxu1 %v3669_v44  ;;  %v3724_v44 = vld [vmem:[%s5443_s2 + $0xb4] ss:$8 sps:$4 sm:$0xff]  }
  0xfd   :  { %3605 = vmatprep.subr.bf16.mxu1 %v4208_v1 }
 0x100   :  { %3606 = vmatpush3.bf16.msra.mxu1 %v3672_v46  ;;  %v3727_v46 = vld [vmem:[%s5443_s2 + $0xc4] ss:$8 sps:$4 sm:$0xff]  }
 0x101   :  { %3607 = vmatprep.subr.bf16.mxu1 %v4208_v1 }
 0x104   :  { %3608 = vmatpush3.bf16.msra.mxu1 %v3675_v49  ;;  %v3728_v49 = vld [vmem:[%s5443_s2 + $0xd0] ss:$8 sps:$4 sm:$0xff]  }
 0x105   :  { %3609 = vmatprep.subr.bf16.mxu1 %v4208_v1 }
 0x108   :  { %3610 = vmatpush3.bf16.msra.mxu1 %v3678_v52  ;;  %v3736_v52 = vld [vmem:[%s5443_s2 + $0xf4] ss:$8 sps:$4 sm:$0xff]  }
 0x109   :  { %3611 = vmatprep.subr.bf16.mxu1 %v4208_v1 }
 0x10c   :  { %3612 = vmatpush3.bf16.msra.mxu1 %v3681_v55  ;;  %v3740_v55 = vld [vmem:[%s5443_s2 + $0x200] ss:$8 sps:$4 sm:$0xff]  }
 0x10d   :  { %3613 = vmatprep.subr.bf16.mxu1 %v4208_v1 }
 0x110   :  { %3614 = vmatpush3.bf16.msra.mxu1 %v3684_v58  ;;  %v3748_v58 = vld [vmem:[%s5443_s2 + $0x214] ss:$8 sps:$4 sm:$0xff]  }
 0x111   :  { %3615 = vmatprep.subr.bf16.mxu1 %v4208_v1 }
 0x114   :  { %3616 = vmatpush3.bf16.msra.mxu1 %v3687_v61  ;;  %v3758_v61 = vld [vmem:[%s5443_s2 + $0x230] ss:$8 sps:$4 sm:$0xff]  }
 0x115   :  { %1510 = vmatprep.subr.bf16.mxu1 %v3742_v56  ;;  %v3799_v56 = vld [vmem:[%s5443_s2 + $0x1a4] ss:$8 sps:$4 sm:$0xff]  }
 0x1ca   :  { %v3558_v0 = vpop.f32.mrb[0].mxu1 }
 0x1cb   :  { %v3559_v3 = vpop.f32.mrb[1].mxu1 }
 0x1cc   :  { %v3560_v1 = vadd.f32 %v3559_v3, %v3558_v0  ;;  %v3561_v4 = vpop.f32.mrb[2].mxu1  ;;  %v3766_v0 = vld [vmem:[%s5443_s2 + $0x244] ss:$8 sps:$4 sm:$0xff]   ;;  %v3772_v3 = vld [vmem:[%s5443_s2 + $0x254] ss:$8 sps:$4 sm:$0xff]  }
 0x1cd   :  { %v3562_v6 = vpop.f32.mrb[3].mxu1 }
 0x1ce   :  { %v294_v7 = vmul.f32 %v3560_v1, %v122_v2  ;;  %v3563_v8 = vadd.f32 %v3562_v6, %v3561_v4  ;;  %v3776_v1 = vld [vmem:[%s5443_s2 + $0x260] ss:$8 sps:$4 sm:$0xff]   ;;  %v3778_v4 = vld [vmem:[%s5443_s2 + $0x264] ss:$8 sps:$4 sm:$0xff]   ;;  %v3784_v6 = vld [vmem:[%s5443_s2 + $0x274] ss:$8 sps:$4 sm:$0xff]  }
 0x1d0   :  { %v296_v10 = vadd.f32 %v294_v7, %v123_v5  ;;  %v295_v11 = vmul.f32 %v3563_v8, %v122_v2  ;;  %v3770_v2 = vld [vmem:[%s5443_s2 + $0x250] ss:$8 sps:$4 sm:$0xff]   ;;  %v3788_v7 = vld [vmem:[%s5443_s2 + $0x280] ss:$8 sps:$4 sm:$0xff]   ;;  %v3790_v8 = vld [vmem:[%s5443_s2 + $0x284] ss:$8 sps:$4 sm:$0xff]  }
 0x1d2   :  { %vm298_vm5 = vcmp.gt.f32.partialorder %v296_v10, 0.0  ;;  %v301_v12 = vmul.f32 %v300_v9, %v296_v10  ;;  %v297_v13 = vadd.f32 %v295_v11, %v123_v5  ;;  %v3782_v5 = vld [vmem:[%s5443_s2 + $0x270] ss:$8 sps:$4 sm:$0xff]   ;;  %v3800_v11 = vld [vmem:[%s5443_s2 + $0x2a0] ss:$8 sps:$4 sm:$0xff]  }
 0x1d4   :  { %v303_v14 = vsel %vm298_vm5, %v296_v10, %v301_v12  ;;  %vm299_vm6 = vcmp.gt.f32.partialorder %v297_v13, 0.0  ;;  %v302_v15 = vmul.f32 %v300_v9, %v297_v13  ;;  %v3794_v9 = vld [vmem:[%s5443_s2 + $0x290] ss:$8 sps:$4 sm:$0xff]   ;;  %v3796_v10 = vld [vmem:[%s5443_s2 + $0x294] ss:$8 sps:$4 sm:$0xff]  }
 0x1d5   :  { %305 = vst [vmem:[#allocation2] sm:$0xff] %v303_v14  ;;  %v3802_v12 = vld [vmem:[%s5443_s2 + $0x2a4] ss:$8 sps:$4 sm:$0xff]   ;;  %v3808_v14 = vld [vmem:[%s5443_s2 + $0x2b4] ss:$8 sps:$4 sm:$0xff]  }
 0x1d6   :  { %v304_v16 = vsel %vm299_vm6, %v297_v13, %v302_v15  ;;  %v3806_v13 = vld [vmem:[%s5443_s2 + $0x2b0] ss:$8 sps:$4 sm:$0xff]   ;;  %v3812_v15 = vld [vmem:[%s5443_s2 + $0x2c0] ss:$8 sps:$4 sm:$0xff]  }
 0x1d7   :  { %306 = vst [vmem:[#allocation2 + $0x8] sm:$0x3f] %v304_v16  ;;  %v3814_v16 = vld [vmem:[%s5443_s2 + $0x2c4] ss:$8 sps:$4 sm:$0xff]  }
 0x1de   :  { %v309_v17 = vld [vmem:[#allocation2 + $0x1] ss:$2 sm:$0x3f]  ;;  %v311_v18 = vld [vmem:[#allocation2 + $0x2] ss:$2 sm:$0x3f] }
 0x1df   :  { %v313_v19 = vpack.c.bf16 %v309_v17, %v309_v17  ;;  %v314_v20 = vpack.c.bf16 %v311_v18, %v311_v18  ;;  %v307_v21 = vld [vmem:[#allocation2] ss:$2 sm:$0x3f] }
 0x1e0   :  { %v312_v23 = vpack.c.bf16 %v307_v21, %v307_v21 }
 0x1e1   :  { %542 = vmatprep.mubr.bf16.mxu0 %v313_v19  ;;  %3618 = vmatmul.mubr.bf16.vlgmr.msra.gmra.mrb[4].mxu1 %v314_v20 }
 0x1e2   :  { %543 = vmatmul.mubr.bf16.vlgmr.msra.gmra.mrb[4].mxu0 %v312_v23  ;;  %1511 = vmatpush1.bf16.msra.mxu1 %v3740_v55  ;;  %v3791_v55 = vld [vmem:[%s5443_s2 + $0x190] ss:$8 sps:$4 sm:$0xff]  }
 0x1e3   :  { %799 = vmatpush1.bf16.msra.mxu0 %v3689_v22  ;;  %1512 = vmatprep.subr.bf16.mxu1 %v3748_v58  ;;  %v3805_v58 = vld [vmem:[%s5443_s2 + $0x1b4] ss:$8 sps:$4 sm:$0xff]  }
 0x1e4   :  { %800 = vmatprep.subr.bf16.mxu0 %v3694_v24 }
 0x1e6   :  { %1513 = vmatpush1.bf16.msra.mxu1 %v3746_v57  ;;  %v3797_v57 = vld [vmem:[%s5443_s2 + $0x1a0] ss:$8 sps:$4 sm:$0xff]  }
 0x1e7   :  { %801 = vmatpush1.bf16.msra.mxu0 %v3692_v25  ;;  %1514 = vmatprep.subr.bf16.mxu1 %v3754_v60  ;;  %v315_v25 = vld [vmem:[%s5445_s4 + $0x4] ss:$0 sm:$0xff] }
 0x1e8   :  { %802 = vmatprep.subr.bf16.mxu0 %v3697_v26  ;;  %v3811_v60 = vld [vmem:[%s5443_s2 + $0x1c4] ss:$8 sps:$4 sm:$0xff]  }
 0x1ea   :  { %1515 = vmatpush1.bf16.msra.mxu1 %v3752_v59  ;;  %v3803_v59 = vld [vmem:[%s5443_s2 + $0x1b0] ss:$8 sps:$4 sm:$0xff]  }
 0x1eb   :  { %803 = vmatpush1.bf16.msra.mxu0 %v3695_v27  ;;  %1516 = vmatprep.subr.bf16.mxu1 %v3760_v62  ;;  %v3817_v62 = vld [vmem:[%s5443_s2 + $0x1d4] ss:$8 sps:$4 sm:$0xff]  }
 0x1ec   :  { %804 = vmatprep.subr.bf16.mxu0 %v3700_v28  ;;  %v316_v28 = vld [vmem:[%s5445_s4 + $0x5] ss:$0 sm:$0xff] }
 0x1ee   :  { %1517 = vmatpush1.bf16.msra.mxu1 %v3758_v61  ;;  %v3809_v61 = vld [vmem:[%s5443_s2 + $0x1c0] ss:$8 sps:$4 sm:$0xff]  }
 0x1ef   :  { %805 = vmatpush1.bf16.msra.mxu0 %v3698_v29  ;;  %1518 = vmatprep.subr.bf16.mxu1 %v3766_v0  ;;  %v3820_v0 = vld [vmem:[%s5443_s2 + $0x2d4] ss:$8 sps:$4 sm:$0xff]  }
 0x1f0   :  { %806 = vmatprep.subr.bf16.mxu0 %v3703_v30  ;;  %v593_v30 = vstv %s3184_s25 }
 0x1f2   :  { %1519 = vmatpush1.bf16.msra.mxu1 %v3764_v63  ;;  %v3815_v63 = vld [vmem:[%s5443_s2 + $0x1d0] ss:$8 sps:$4 sm:$0xff]  }
 0x1f3   :  { %807 = vmatpush1.bf16.msra.mxu0 %v3701_v31  ;;  %1520 = vmatprep.subr.bf16.mxu1 %v3772_v3  ;;  %v3823_v3 = vld [vmem:[%s5443_s2 + $0x1e4] ss:$8 sps:$4 sm:$0xff]  }
 0x1f4   :  { %808 = vmatprep.subr.bf16.mxu0 %v3706_v32 }
 0x1f6   :  { %1521 = vmatpush1.bf16.msra.mxu1 %v3770_v2  ;;  %v3818_v2 = vld [vmem:[%s5443_s2 + $0x2d0] ss:$8 sps:$4 sm:$0xff]  }
 0x1f7   :  { %809 = vmatpush1.bf16.msra.mxu0 %v3704_v33  ;;  %1522 = vmatprep.subr.bf16.mxu1 %v3778_v4  ;;  %v3826_v4 = vld [vmem:[%s5443_s2 + $0x2e4] ss:$8 sps:$4 sm:$0xff]  }
 0x1f8   :  { %810 = vmatprep.subr.bf16.mxu0 %v3709_v34 }
 0x1fa   :  { %1523 = vmatpush1.bf16.msra.mxu1 %v3776_v1  ;;  %v3821_v1 = vld [vmem:[%s5443_s2 + $0x1e0] ss:$8 sps:$4 sm:$0xff]  }
 0x1fb   :  { %811 = vmatpush1.bf16.msra.mxu0 %v3707_v35  ;;  %1524 = vmatprep.subr.bf16.mxu1 %v3784_v6  ;;  %v3827_v6 = vld [vmem:[%s5443_s2 + $0x1f0] ss:$8 sps:$4 sm:$0xff]  }
 0x1fc   :  { %812 = vmatprep.subr.bf16.mxu0 %v3712_v36  ;;  %v3737_v36 = vld [vmem:[%s5443_s2 + $0x100] ss:$8 sps:$4 sm:$0xff]  }
 0x1fe   :  { %1525 = vmatpush1.bf16.msra.mxu1 %v3782_v5  ;;  %v3824_v5 = vld [vmem:[%s5443_s2 + $0x2e0] ss:$8 sps:$4 sm:$0xff]  }
 0x1ff   :  { %813 = vmatpush1.bf16.msra.mxu0 %v3710_v37  ;;  %1526 = vmatprep.subr.bf16.mxu1 %v3790_v8  ;;  %v3830_v8 = vld [vmem:[%s5443_s2 + $0x2f0] ss:$8 sps:$4 sm:$0xff]  }
 0x200   :  { %814 = vmatprep.subr.bf16.mxu0 %v3715_v38  ;;  %v3745_v38 = vld [vmem:[%s5443_s2 + $0x114] ss:$8 sps:$4 sm:$0xff]  }
 0x202   :  { %1527 = vmatpush1.bf16.msra.mxu1 %v3788_v7  ;;  %v3829_v7 = vld [vmem:[%s5443_s2 + $0x1f4] ss:$8 sps:$4 sm:$0xff]  }
 0x203   :  { %815 = vmatpush1.bf16.msra.mxu0 %v3713_v39  ;;  %1528 = vmatprep.subr.bf16.mxu1 %v3796_v10  ;;  %v3743_v39 = vld [vmem:[%s5443_s2 + $0x110] ss:$8 sps:$4 sm:$0xff]   ;;  %v3835_v10 = vld [vmem:[%s5443_s2 + $0x304] ss:$8 sps:$4 sm:$0xff]  }
 0x204   :  { %816 = vmatprep.subr.bf16.mxu0 %v3718_v40  ;;  %v3751_v40 = vld [vmem:[%s5443_s2 + $0x124] ss:$8 sps:$4 sm:$0xff]  }
 0x206   :  { %1529 = vmatpush1.bf16.msra.mxu1 %v3794_v9  ;;  %v3832_v9 = vld [vmem:[%s5443_s2 + $0x2f4] ss:$8 sps:$4 sm:$0xff]  }
 0x207   :  { %817 = vmatpush1.bf16.msra.mxu0 %v3716_v41  ;;  %1530 = vmatprep.subr.bf16.mxu1 %v3802_v12  ;;  %v3749_v41 = vld [vmem:[%s5443_s2 + $0x120] ss:$8 sps:$4 sm:$0xff]  }
 0x208   :  { %818 = vmatprep.subr.bf16.mxu0 %v3721_v42  ;;  %v3757_v42 = vld [vmem:[%s5443_s2 + $0x134] ss:$8 sps:$4 sm:$0xff]  }
 0x20a   :  { %1531 = vmatpush1.bf16.msra.mxu1 %v3800_v11  ;;  %v840_v11 = vlaneseq }
 0x20b   :  { %819 = vmatpush1.bf16.msra.mxu0 %v3719_v43  ;;  %1532 = vmatprep.subr.bf16.mxu1 %v3808_v14  ;;  %v3755_v43 = vld [vmem:[%s5443_s2 + $0x130] ss:$8 sps:$4 sm:$0xff]   ;;  %v3209_v14 = vld [vmem:[%s5445_s4 + $0x6] ss:$8 sm:$0x3] }
 0x20c   :  { %820 = vmatprep.subr.bf16.mxu0 %v3724_v44  ;;  %v3763_v44 = vld [vmem:[%s5443_s2 + $0x144] ss:$8 sps:$4 sm:$0xff]   ;;  %v4697_v12 = vshrl.u32 %v840_v11, 7  ;;  %v3881_v11 = vld [vmem:[%s5444_s3] ss:$16 sps:$4 sm:$0xff]  }
 0x20e   :  { %1533 = vmatpush1.bf16.msra.mxu1 %v3806_v13  ;;  %v4700_v13 = vsub.s32 0, %v4697_v12 }
 0x20f   :  { %821 = vmatpush1.bf16.msra.mxu0 %v3722_v45  ;;  %1534 = vmatprep.subr.bf16.mxu1 %v3814_v16  ;;  %v3761_v45 = vld [vmem:[%s5443_s2 + $0x140] ss:$8 sps:$4 sm:$0xff]   ;;  %v3210_v16 = vld [vmem:[%s5445_s4 + $0x7] ss:$8 sm:$0x3] }
 0x210   :  { %822 = vmatprep.subr.bf16.mxu0 %v3727_v46  ;;  %v3769_v46 = vld [vmem:[%s5443_s2 + $0x154] ss:$8 sps:$4 sm:$0xff]  }
 0x212   :  { %1535 = vmatpush1.bf16.msra.mxu1 %v3812_v15  ;;  %v4706_v15 = vsub.s32 1, %v4697_v12 }
 0x213   :  { %823 = vmatpush1.bf16.msra.mxu0 %v3725_v47  ;;  %v3767_v47 = vld [vmem:[%s5443_s2 + $0x150] ss:$8 sps:$4 sm:$0xff]   ;;  %1536 = vmatprep.subr.bf16.mxu1 %v3820_v0 }
 0x214   :  { %824 = vmatprep.subr.bf16.mxu0 %v3730_v48  ;;  %v3775_v48 = vld [vmem:[%s5443_s2 + $0x164] ss:$8 sps:$4 sm:$0xff]   ;;  %v3866_v0 = vld [vmem:[%s5443_s2 + $0x3b0] ss:$8 sps:$4 sm:$0xff]  }
 0x216   :  { %1537 = vmatpush1.bf16.msra.mxu1 %v3818_v2  ;;  %v3871_v2 = vld [vmem:[%s5443_s2 + $0x3c4] ss:$8 sps:$4 sm:$0xff]  }
 0x217   :  { %825 = vmatpush1.bf16.msra.mxu0 %v3728_v49  ;;  %v3773_v49 = vld [vmem:[%s5443_s2 + $0x160] ss:$8 sps:$4 sm:$0xff]   ;;  %1538 = vmatprep.subr.bf16.mxu1 %v3826_v4  ;;  %v3872_v4 = vld [vmem:[%s5443_s2 + $0x3d0] ss:$8 sps:$4 sm:$0xff]  }
 0x218   :  { %826 = vmatprep.subr.bf16.mxu0 %v3733_v51  ;;  %v3779_v51 = vld [vmem:[%s5443_s2 + $0x170] ss:$8 sps:$4 sm:$0xff]  }
 0x21a   :  { %1539 = vmatpush1.bf16.msra.mxu1 %v3824_v5  ;;  %v3877_v5 = vld [vmem:[%s5443_s2 + $0x3e4] ss:$8 sps:$4 sm:$0xff]  }
 0x21b   :  { %827 = vmatpush1.bf16.msra.mxu0 %v3731_v50  ;;  %v3781_v50 = vld [vmem:[%s5443_s2 + $0x174] ss:$8 sps:$4 sm:$0xff]   ;;  %1540 = vmatprep.subr.bf16.mxu1 %v3832_v9 }
 0x21c   :  { %828 = vmatprep.subr.bf16.mxu0 %v3736_v52  ;;  %v3787_v52 = vld [vmem:[%s5443_s2 + $0x184] ss:$8 sps:$4 sm:$0xff]  }
 0x21e   :  { %1541 = vmatpush1.bf16.msra.mxu1 %v3830_v8  ;;  %v3878_v8 = vld [vmem:[%s5443_s2 + $0x3f0] ss:$8 sps:$4 sm:$0xff]  }
 0x21f   :  { %829 = vmatpush1.bf16.msra.mxu0 %v3734_v53  ;;  %v3785_v53 = vld [vmem:[%s5443_s2 + $0x180] ss:$8 sps:$4 sm:$0xff]   ;;  %1551 = vmatprep.subr.bf16.mxu1 %v3835_v10 }
 0x220   :  { %1469 = vmatprep.subr.bf16.mxu0 %v3739_v54  ;;  %v3793_v54 = vld [vmem:[%s5443_s2 + $0x194] ss:$8 sps:$4 sm:$0xff]  }
 0x2b4   :  { %v584_v17 = vpop.f32.mrb[4].mxu1 }
 0x2b5   :  { %v3580_v18 = vpop.f32.mrb[4].mxu0  ;;  %v3619_v19 = vpop.f32.mrb[5].mxu1 }
 0x2b6   :  { %v3581_v20 = vpop.f32.mrb[5].mxu0  ;;  %v587_v21 = vpop.f32.mrb[6].mxu1  ;;  %v856_v19 = vrot.slane %v3210_v16, %v4700_v13 }
 0x2b7   :  { %v3582_v22 = vadd.f32 %v3581_v20, %v3580_v18  ;;  %v3583_v23 = vpop.f32.mrb[6].mxu0  ;;  %v3620_v24 = vpop.f32.mrb[7].mxu1  ;;  %v847_v18 = vrot.slane %v3209_v14, %v4706_v15  ;;  %v860_v21 = vrot.slane %v3210_v16, %v4706_v15  ;;  %v3884_v16 = vld [vmem:[%s5444_s3 + $0x8] ss:$16 sps:$4 sm:$0xff]  }
 0x2b8   :  { %v3584_v26 = vpop.f32.mrb[7].mxu0  ;;  %v867_v24 = vstv %s3211_s27 }
 0x2b9   :  { %v585_v27 = vadd.f32 %v3582_v22, %v584_v17  ;;  %v843_v17 = vrot.slane %v3209_v14, %v4700_v13  ;;  %v3883_v14 = vld [vmem:[%s5444_s3 + $0x4] ss:$16 sps:$4 sm:$0xff]  }
 0x2bb   :  { %v590_v29 = vmul.f32 %v585_v27, %v315_v25 }
 0x2bd   :  { %v591_v31 = vadd.f32 %v590_v29, %v316_v28 }
 0x2bf   :  { %vm592_vm7 = vcmp.gt.f32.partialorder %v591_v31, 0.0  ;;  %v594_v32 = vmul.f32 %v593_v30, %v591_v31 }
 0x2c1   :  { %v595_v33 = vsel %vm592_vm7, %v591_v31, %v594_v32 }
 0x2c2   :  { %v597_v34 = vrot.slane %v595_v33, 1  ;;  %v599_v37 = vpack.c.bf16 %v595_v33, %v595_v33 }
 0x2c4   :  { %v600_v35 = vpack.c.bf16 %v597_v34, %v597_v34 }
 0x2c6   :  { %830 = vmatprep.mubr.bf16.mxu0 %v600_v35 }
 0x2c7   :  { %831 = vmatmul.mubr.bf16.vlgmr.msra.gmra.mrb[8].mxu0 %v599_v37 }
 0x2c8   :  { %1470 = vmatpush1.bf16.msra.mxu0 %v3737_v36 }
 0x2c9   :  { %1471 = vmatprep.subr.bf16.mxu0 %v3745_v38 }
 0x2cc   :  { %1472 = vmatpush1.bf16.msra.mxu0 %v3743_v39 }
 0x2cd   :  { %1473 = vmatprep.subr.bf16.mxu0 %v3751_v40  ;;  %v3833_v40 = vld [vmem:[%s5443_s2 + $0x300] ss:$8 sps:$4 sm:$0xff]  }
 0x2d0   :  { %1474 = vmatpush1.bf16.msra.mxu0 %v3749_v41 }
 0x2d1   :  { %1475 = vmatprep.subr.bf16.mxu0 %v3757_v42  ;;  %v3838_v42 = vld [vmem:[%s5443_s2 + $0x314] ss:$8 sps:$4 sm:$0xff]  }
 0x2d4   :  { %1476 = vmatpush1.bf16.msra.mxu0 %v3755_v43 }
 0x2d5   :  { %1477 = vmatprep.subr.bf16.mxu0 %v3763_v44  ;;  %v3836_v44 = vld [vmem:[%s5443_s2 + $0x310] ss:$8 sps:$4 sm:$0xff]  }
 0x2d8   :  { %1478 = vmatpush1.bf16.msra.mxu0 %v3761_v45  ;;  %v3841_v45 = vld [vmem:[%s5443_s2 + $0x324] ss:$8 sps:$4 sm:$0xff]  }
 0x2d9   :  { %1479 = vmatprep.subr.bf16.mxu0 %v3769_v46  ;;  %v3839_v46 = vld [vmem:[%s5443_s2 + $0x320] ss:$8 sps:$4 sm:$0xff]  }
 0x2dc   :  { %1480 = vmatpush1.bf16.msra.mxu0 %v3767_v47  ;;  %v3844_v47 = vld [vmem:[%s5443_s2 + $0x334] ss:$8 sps:$4 sm:$0xff]  }
 0x2dd   :  { %1481 = vmatprep.subr.bf16.mxu0 %v3775_v48  ;;  %v3842_v48 = vld [vmem:[%s5443_s2 + $0x330] ss:$8 sps:$4 sm:$0xff]  }
 0x2e0   :  { %1482 = vmatpush1.bf16.msra.mxu0 %v3773_v49  ;;  %v3847_v49 = vld [vmem:[%s5443_s2 + $0x344] ss:$8 sps:$4 sm:$0xff]  }
 0x2e1   :  { %1483 = vmatprep.subr.bf16.mxu0 %v3781_v50  ;;  %v3845_v50 = vld [vmem:[%s5443_s2 + $0x340] ss:$8 sps:$4 sm:$0xff]  }
 0x2e4   :  { %1484 = vmatpush1.bf16.msra.mxu0 %v3779_v51  ;;  %v3850_v51 = vld [vmem:[%s5443_s2 + $0x354] ss:$8 sps:$4 sm:$0xff]  }
 0x2e5   :  { %1485 = vmatprep.subr.bf16.mxu0 %v3787_v52  ;;  %v3848_v52 = vld [vmem:[%s5443_s2 + $0x350] ss:$8 sps:$4 sm:$0xff]  }
 0x2e8   :  { %1486 = vmatpush1.bf16.msra.mxu0 %v3785_v53  ;;  %v3853_v53 = vld [vmem:[%s5443_s2 + $0x364] ss:$8 sps:$4 sm:$0xff]  }
 0x2e9   :  { %1487 = vmatprep.subr.bf16.mxu0 %v3793_v54  ;;  %v3851_v54 = vld [vmem:[%s5443_s2 + $0x360] ss:$8 sps:$4 sm:$0xff]  }
 0x2ec   :  { %1488 = vmatpush1.bf16.msra.mxu0 %v3791_v55  ;;  %v3856_v55 = vld [vmem:[%s5443_s2 + $0x374] ss:$8 sps:$4 sm:$0xff]  }
 0x2ed   :  { %1489 = vmatprep.subr.bf16.mxu0 %v3799_v56  ;;  %v3854_v56 = vld [vmem:[%s5443_s2 + $0x370] ss:$8 sps:$4 sm:$0xff]  }
 0x2f0   :  { %1490 = vmatpush1.bf16.msra.mxu0 %v3797_v57  ;;  %v3859_v57 = vld [vmem:[%s5443_s2 + $0x384] ss:$8 sps:$4 sm:$0xff]  }
 0x2f1   :  { %1491 = vmatprep.subr.bf16.mxu0 %v3805_v58  ;;  %v3857_v58 = vld [vmem:[%s5443_s2 + $0x380] ss:$8 sps:$4 sm:$0xff]  }
 0x2f4   :  { %1492 = vmatpush1.bf16.msra.mxu0 %v3803_v59  ;;  %v3862_v59 = vld [vmem:[%s5443_s2 + $0x394] ss:$8 sps:$4 sm:$0xff]  }
 0x2f5   :  { %1493 = vmatprep.subr.bf16.mxu0 %v3811_v60  ;;  %v3860_v60 = vld [vmem:[%s5443_s2 + $0x390] ss:$8 sps:$4 sm:$0xff]  }
 0x2f8   :  { %1494 = vmatpush1.bf16.msra.mxu0 %v3809_v61  ;;  %v3865_v61 = vld [vmem:[%s5443_s2 + $0x3a4] ss:$8 sps:$4 sm:$0xff]  }
 0x2f9   :  { %1495 = vmatprep.subr.bf16.mxu0 %v3817_v62  ;;  %v3863_v62 = vld [vmem:[%s5443_s2 + $0x3a0] ss:$8 sps:$4 sm:$0xff]  }
 0x2fc   :  { %1496 = vmatpush1.bf16.msra.mxu0 %v3815_v63  ;;  %v3868_v63 = vld [vmem:[%s5443_s2 + $0x3b4] ss:$8 sps:$4 sm:$0xff]  }
 0x2fd   :  { %1497 = vmatprep.subr.bf16.mxu0 %v3823_v3  ;;  %v3869_v3 = vld [vmem:[%s5443_s2 + $0x3c0] ss:$8 sps:$4 sm:$0xff]  }
 0x300   :  { %1498 = vmatpush1.bf16.msra.mxu0 %v3821_v1  ;;  %v3874_v1 = vld [vmem:[%s5443_s2 + $0x3d4] ss:$8 sps:$4 sm:$0xff]  }
 0x301   :  { %1499 = vmatprep.subr.bf16.mxu0 %v3829_v7  ;;  %v3880_v7 = vld [vmem:[%s5443_s2 + $0x3f4] ss:$8 sps:$4 sm:$0xff]  }
 0x304   :  { %1500 = vmatpush1.bf16.msra.mxu0 %v3827_v6  ;;  %v3875_v6 = vld [vmem:[%s5443_s2 + $0x3e0] ss:$8 sps:$4 sm:$0xff]  }
 0x305   :  { %2798 = vmatprep.subr.bf16.mxu0 %v3883_v14  ;;  %v3971_v14 = vld [vmem:[%s5444_s3 + $0x1e0] ss:$16 sps:$4 sm:$0xff]  }
 0x39a   :  { %v832_v20 = vpop.f32.mrb[8].mxu0 }
 0x39b   :  { %v850_v22 = vmul.f32 %v843_v17, %v832_v20  ;;  %v834_v23 = vpop.f32.mrb[9].mxu0  ;;  %v3886_v17 = vld [vmem:[%s5444_s3 + $0xc] ss:$16 sps:$4 sm:$0xff]   ;;  %v3887_v20 = vld [vmem:[%s5444_s3 + $0x20] ss:$16 sps:$4 sm:$0xff]  }
 0x39c   :  { %v851_v25 = vmul.f32 %v847_v18, %v834_v23  ;;  %v836_v26 = vpop.f32.mrb[10].mxu0  ;;  %v3889_v18 = vld [vmem:[%s5444_s3 + $0x24] ss:$16 sps:$4 sm:$0xff]   ;;  %v3898_v23 = vld [vmem:[%s5444_s3 + $0x4c] ss:$16 sps:$4 sm:$0xff]  }
 0x39d   :  { %v863_v27 = vadd.f32 %v856_v19, %v850_v22  ;;  %v837_v28 = vpop.f32.mrb[11].mxu0  ;;  %v3892_v19 = vld [vmem:[%s5444_s3 + $0x2c] ss:$16 sps:$4 sm:$0xff]   ;;  %v3895_v22 = vld [vmem:[%s5444_s3 + $0x44] ss:$16 sps:$4 sm:$0xff]  }
 0x39e   :  { %v864_v29 = vadd.f32 %v860_v21, %v851_v25  ;;  %v3890_v21 = vld [vmem:[%s5444_s3 + $0x28] ss:$16 sps:$4 sm:$0xff]   ;;  %v3901_v26 = vld [vmem:[%s5444_s3 + $0x64] ss:$16 sps:$4 sm:$0xff]   ;;  %v3899_v28 = vld [vmem:[%s5444_s3 + $0x60] ss:$16 sps:$4 sm:$0xff]  }
 0x39f   :  { %vm865_vm8 = vcmp.gt.f32.partialorder %v863_v27, 0.0  ;;  %v868_v30 = vmul.f32 %v867_v24, %v863_v27  ;;  %v3896_v25 = vld [vmem:[%s5444_s3 + $0x48] ss:$16 sps:$4 sm:$0xff]  }
 0x3a0   :  { %vm866_vm9 = vcmp.gt.f32.partialorder %v864_v29, 0.0  ;;  %v869_v31 = vmul.f32 %v867_v24, %v864_v29  ;;  %v3893_v24 = vld [vmem:[%s5444_s3 + $0x40] ss:$16 sps:$4 sm:$0xff]  }
 0x3a1   :  { %v4715_v32 = vsel %vm865_vm8, %v863_v27, %v868_v30  ;;  %v3904_v27 = vld [vmem:[%s5444_s3 + $0x6c] ss:$16 sps:$4 sm:$0xff]   ;;  %v3907_v30 = vld [vmem:[%s5444_s3 + $0x84] ss:$16 sps:$4 sm:$0xff]  }
 0x3a2   :  { %v871_v33 = vsel %vm866_vm9, %v864_v29, %v869_v31  ;;  %v874_v34 = vrot.slane %v4715_v32, 1  ;;  %v882_v38 = vpack.c.bf16 %v4715_v32, %v4715_v32  ;;  %v878_v9 = vrot.slane %v4715_v32, 2  ;;  %v3902_v29 = vld [vmem:[%s5444_s3 + $0x68] ss:$16 sps:$4 sm:$0xff]   ;;  %v3910_v31 = vld [vmem:[%s5444_s3 + $0x8c] ss:$16 sps:$4 sm:$0xff]  }
 0x3a3   :  { %v883_v35 = vpack.c.bf16 %v871_v33, %v871_v33  ;;  %v875_v36 = vrot.slane %v871_v33, 1  ;;  %v879_v37 = vrot.slane %v871_v33, 2  ;;  %v3905_v32 = vld [vmem:[%s5444_s3 + $0x80] ss:$16 sps:$4 sm:$0xff]   ;;  %v3908_v33 = vld [vmem:[%s5444_s3 + $0x88] ss:$16 sps:$4 sm:$0xff]  }
 0x3a4   :  { %v884_v41 = vpack.c.bf16 %v874_v34, %v874_v34  ;;  %v886_v10 = vpack.c.bf16 %v878_v9, %v878_v9  ;;  %v3913_v34 = vld [vmem:[%s5444_s3 + $0xa4] ss:$16 sps:$4 sm:$0xff]   ;;  %v3968_v9 = vld [vmem:[%s5444_s3 + $0x1c8] ss:$16 sps:$4 sm:$0xff]  }
 0x3a5   :  { %1501 = vmatprep.mubr.bf16.mxu0 %v883_v35  ;;  %v885_v39 = vpack.c.bf16 %v875_v36, %v875_v36  ;;  %v887_v43 = vpack.c.bf16 %v879_v37, %v879_v37  ;;  %v3916_v35 = vld [vmem:[%s5444_s3 + $0xac] ss:$16 sps:$4 sm:$0xff]   ;;  %v3911_v36 = vld [vmem:[%s5444_s3 + $0xa0] ss:$16 sps:$4 sm:$0xff]   ;;  %v3914_v37 = vld [vmem:[%s5444_s3 + $0xa8] ss:$16 sps:$4 sm:$0xff]  }
 0x3a6   :  { %1502 = vmatmul.mubr.bf16.vlgmr.msra.gmra.mrb[12].mxu0 %v882_v38  ;;  %v3919_v38 = vld [vmem:[%s5444_s3 + $0xc4] ss:$16 sps:$4 sm:$0xff]  }
 0x3a7   :  { %1542 = vmatprep.mubr.bf16.mxu1 %v885_v39  ;;  %2799 = vmatpush1.bf16.msra.mxu0 %v3881_v11  ;;  %v3922_v39 = vld [vmem:[%s5444_s3 + $0xcc] ss:$16 sps:$4 sm:$0xff]  }
 0x3a8   :  { %1543 = vmatmul.mubr.bf16.vlgmr.msra.gmra.mrb[8].mxu1 %v884_v41  ;;  %2800 = vmatprep.subr.bf16.mxu0 %v3889_v18  ;;  %v3920_v41 = vld [vmem:[%s5444_s3 + $0xc8] ss:$16 sps:$4 sm:$0xff]   ;;  %v3976_v11 = vld [vmem:[%s5444_s3 + $0x1ec] ss:$16 sps:$4 sm:$0xff]  }
 0x3a9   :  { %1552 = vmatpush1.bf16.msra.mxu1 %v3833_v40  ;;  %1583 = vmatprep.mubr.bf16.mxu1 %v887_v43  ;;  %v3917_v40 = vld [vmem:[%s5444_s3 + $0xc0] ss:$16 sps:$4 sm:$0xff]   ;;  %v3928_v43 = vld [vmem:[%s5444_s3 + $0xec] ss:$16 sps:$4 sm:$0xff]  }
 0x3aa   :  { %1553 = vmatprep.subr.bf16.mxu1 %v3838_v42  ;;  %v3925_v42 = vld [vmem:[%s5444_s3 + $0xe4] ss:$16 sps:$4 sm:$0xff]   ;;  %v3982_v18 = vld [vmem:[%s5444_s3 + $0x20c] ss:$16 sps:$4 sm:$0xff]  }
 0x3ab   :  { %2801 = vmatpush1.bf16.msra.mxu0 %v3887_v20 }
 0x3ac   :  { %2802 = vmatprep.subr.bf16.mxu0 %v3895_v22 }
 0x3ad   :  { %1554 = vmatpush1.bf16.msra.mxu1 %v3836_v44  ;;  %v3923_v44 = vld [vmem:[%s5444_s3 + $0xe0] ss:$16 sps:$4 sm:$0xff]  }
 0x3ae   :  { %1555 = vmatprep.subr.bf16.mxu1 %v3841_v45  ;;  %v3926_v45 = vld [vmem:[%s5444_s3 + $0xe8] ss:$16 sps:$4 sm:$0xff]  }
 0x3af   :  { %2803 = vmatpush1.bf16.msra.mxu0 %v3893_v24  ;;  %v3245_v24 = vld [vmem:[%s5445_s4 + $0x21] ss:$8 sm:$0x3] }
 0x3b0   :  { %2804 = vmatprep.subr.bf16.mxu0 %v3901_v26 }
 0x3b1   :  { %1556 = vmatpush1.bf16.msra.mxu1 %v3839_v46  ;;  %v3931_v46 = vld [vmem:[%s5444_s3 + $0x104] ss:$16 sps:$4 sm:$0xff]  }
 0x3b2   :  { %1557 = vmatprep.subr.bf16.mxu1 %v3844_v47  ;;  %v3934_v47 = vld [vmem:[%s5444_s3 + $0x10c] ss:$16 sps:$4 sm:$0xff]  }
 0x3b3   :  { %2805 = vmatpush1.bf16.msra.mxu0 %v3899_v28 }
 0x3b4   :  { %2806 = vmatprep.subr.bf16.mxu0 %v3907_v30 }
 0x3b5   :  { %1558 = vmatpush1.bf16.msra.mxu1 %v3842_v48  ;;  %v3929_v48 = vld [vmem:[%s5444_s3 + $0x100] ss:$16 sps:$4 sm:$0xff]  }
 0x3b6   :  { %1559 = vmatprep.subr.bf16.mxu1 %v3847_v49  ;;  %v3932_v49 = vld [vmem:[%s5444_s3 + $0x108] ss:$16 sps:$4 sm:$0xff]  }
 0x3b7   :  { %2807 = vmatpush1.bf16.msra.mxu0 %v3905_v32  ;;  %v1613_v32 = vrot.slane %v3245_v24, %v4706_v15 }
 0x3b8   :  { %2808 = vmatprep.subr.bf16.mxu0 %v3913_v34 }
 0x3b9   :  { %1560 = vmatpush1.bf16.msra.mxu1 %v3845_v50  ;;  %v3937_v50 = vld [vmem:[%s5444_s3 + $0x124] ss:$16 sps:$4 sm:$0xff]  }
 0x3ba   :  { %1561 = vmatprep.subr.bf16.mxu1 %v3850_v51  ;;  %v3940_v51 = vld [vmem:[%s5444_s3 + $0x12c] ss:$16 sps:$4 sm:$0xff]  }
 0x3bb   :  { %2809 = vmatpush1.bf16.msra.mxu0 %v3911_v36  ;;  %v1620_v36 = vstv %s3246_s7 }
 0x3bc   :  { %2810 = vmatprep.subr.bf16.mxu0 %v3919_v38 }
 0x3bd   :  { %1562 = vmatpush1.bf16.msra.mxu1 %v3848_v52  ;;  %v3935_v52 = vld [vmem:[%s5444_s3 + $0x120] ss:$16 sps:$4 sm:$0xff]  }
 0x3be   :  { %1563 = vmatprep.subr.bf16.mxu1 %v3853_v53  ;;  %v3938_v53 = vld [vmem:[%s5444_s3 + $0x128] ss:$16 sps:$4 sm:$0xff]  }
 0x3bf   :  { %2811 = vmatpush1.bf16.msra.mxu0 %v3917_v40 }
 0x3c0   :  { %2812 = vmatprep.subr.bf16.mxu0 %v3925_v42 }
 0x3c1   :  { %1564 = vmatpush1.bf16.msra.mxu1 %v3851_v54  ;;  %v3943_v54 = vld [vmem:[%s5444_s3 + $0x144] ss:$16 sps:$4 sm:$0xff]  }
 0x3c2   :  { %1565 = vmatprep.subr.bf16.mxu1 %v3856_v55  ;;  %v3946_v55 = vld [vmem:[%s5444_s3 + $0x14c] ss:$16 sps:$4 sm:$0xff]  }
 0x3c3   :  { %2813 = vmatpush1.bf16.msra.mxu0 %v3923_v44 }
 0x3c4   :  { %2814 = vmatprep.subr.bf16.mxu0 %v3931_v46  ;;  %v3980_v46 = vld [vmem:[%s5444_s3 + $0x208] ss:$16 sps:$4 sm:$0xff]  }
 0x3c5   :  { %1566 = vmatpush1.bf16.msra.mxu1 %v3854_v56  ;;  %v3941_v56 = vld [vmem:[%s5444_s3 + $0x140] ss:$16 sps:$4 sm:$0xff]  }
 0x3c6   :  { %1567 = vmatprep.subr.bf16.mxu1 %v3859_v57  ;;  %v3944_v57 = vld [vmem:[%s5444_s3 + $0x148] ss:$16 sps:$4 sm:$0xff]  }
 0x3c7   :  { %2815 = vmatpush1.bf16.msra.mxu0 %v3929_v48 }
 0x3c8   :  { %2816 = vmatprep.subr.bf16.mxu0 %v3937_v50  ;;  %v3985_v50 = vld [vmem:[%s5444_s3 + $0x224] ss:$16 sps:$4 sm:$0xff]  }
 0x3c9   :  { %1568 = vmatpush1.bf16.msra.mxu1 %v3857_v58  ;;  %v3949_v58 = vld [vmem:[%s5444_s3 + $0x164] ss:$16 sps:$4 sm:$0xff]  }
 0x3ca   :  { %1569 = vmatprep.subr.bf16.mxu1 %v3862_v59  ;;  %v3952_v59 = vld [vmem:[%s5444_s3 + $0x16c] ss:$16 sps:$4 sm:$0xff]  }
 0x3cb   :  { %2817 = vmatpush1.bf16.msra.mxu0 %v3935_v52  ;;  %v3983_v52 = vld [vmem:[%s5444_s3 + $0x220] ss:$16 sps:$4 sm:$0xff]  }
 0x3cc   :  { %2818 = vmatprep.subr.bf16.mxu0 %v3943_v54  ;;  %v3991_v54 = vld [vmem:[%s5444_s3 + $0x244] ss:$16 sps:$4 sm:$0xff]  }
 0x3cd   :  { %1570 = vmatpush1.bf16.msra.mxu1 %v3860_v60  ;;  %v3947_v60 = vld [vmem:[%s5444_s3 + $0x160] ss:$16 sps:$4 sm:$0xff]  }
 0x3ce   :  { %1571 = vmatprep.subr.bf16.mxu1 %v3865_v61  ;;  %v3950_v61 = vld [vmem:[%s5444_s3 + $0x168] ss:$16 sps:$4 sm:$0xff]  }
 0x3cf   :  { %2819 = vmatpush1.bf16.msra.mxu0 %v3941_v56  ;;  %v3989_v56 = vld [vmem:[%s5444_s3 + $0x240] ss:$16 sps:$4 sm:$0xff]  }
 0x3d0   :  { %2820 = vmatprep.subr.bf16.mxu0 %v3949_v58  ;;  %v3997_v58 = vld [vmem:[%s5444_s3 + $0x264] ss:$16 sps:$4 sm:$0xff]  }
 0x3d1   :  { %1572 = vmatpush1.bf16.msra.mxu1 %v3863_v62  ;;  %v3955_v62 = vld [vmem:[%s5444_s3 + $0x184] ss:$16 sps:$4 sm:$0xff]  }
 0x3d2   :  { %1573 = vmatprep.subr.bf16.mxu1 %v3868_v63  ;;  %v3958_v63 = vld [vmem:[%s5444_s3 + $0x18c] ss:$16 sps:$4 sm:$0xff]  }
 0x3d3   :  { %2821 = vmatpush1.bf16.msra.mxu0 %v3947_v60  ;;  %v3995_v60 = vld [vmem:[%s5444_s3 + $0x260] ss:$16 sps:$4 sm:$0xff]  }
 0x3d4   :  { %2822 = vmatprep.subr.bf16.mxu0 %v3955_v62  ;;  %v4003_v62 = vld [vmem:[%s5444_s3 + $0x284] ss:$16 sps:$4 sm:$0xff]  }
 0x3d5   :  { %1574 = vmatpush1.bf16.msra.mxu1 %v3866_v0  ;;  %v3953_v0 = vld [vmem:[%s5444_s3 + $0x180] ss:$16 sps:$4 sm:$0xff]  }
 0x3d6   :  { %1575 = vmatprep.subr.bf16.mxu1 %v3871_v2  ;;  %v3956_v2 = vld [vmem:[%s5444_s3 + $0x188] ss:$16 sps:$4 sm:$0xff]  }
 0x3d7   :  { %2823 = vmatpush1.bf16.msra.mxu0 %v3953_v0  ;;  %v4001_v0 = vld [vmem:[%s5444_s3 + $0x280] ss:$16 sps:$4 sm:$0xff]  }
 0x3d9   :  { %1576 = vmatpush1.bf16.msra.mxu1 %v3869_v3  ;;  %v3961_v3 = vld [vmem:[%s5444_s3 + $0x1a4] ss:$16 sps:$4 sm:$0xff]  }
 0x3da   :  { %1577 = vmatprep.subr.bf16.mxu1 %v3874_v1  ;;  %v3964_v1 = vld [vmem:[%s5444_s3 + $0x1ac] ss:$16 sps:$4 sm:$0xff]   ;;  %2824 = vmatprep.subr.bf16.mxu0 %v3961_v3  ;;  %v4009_v3 = vld [vmem:[%s5444_s3 + $0x2a4] ss:$16 sps:$4 sm:$0xff]  }
 0x3dd   :  { %1578 = vmatpush1.bf16.msra.mxu1 %v3872_v4  ;;  %v3959_v4 = vld [vmem:[%s5444_s3 + $0x1a0] ss:$16 sps:$4 sm:$0xff]  }
 0x3de   :  { %1579 = vmatprep.subr.bf16.mxu1 %v3877_v5  ;;  %v3962_v5 = vld [vmem:[%s5444_s3 + $0x1a8] ss:$16 sps:$4 sm:$0xff]   ;;  %2825 = vmatpush1.bf16.msra.mxu0 %v3959_v4  ;;  %v4007_v4 = vld [vmem:[%s5444_s3 + $0x2a0] ss:$16 sps:$4 sm:$0xff]  }
 0x3e1   :  { %1580 = vmatpush1.bf16.msra.mxu1 %v3875_v6  ;;  %v3967_v6 = vld [vmem:[%s5444_s3 + $0x1c4] ss:$16 sps:$4 sm:$0xff]  }
 0x3e2   :  { %1581 = vmatprep.subr.bf16.mxu1 %v3880_v7  ;;  %v3970_v7 = vld [vmem:[%s5444_s3 + $0x1cc] ss:$16 sps:$4 sm:$0xff]   ;;  %2826 = vmatprep.subr.bf16.mxu0 %v3967_v6  ;;  %v4015_v6 = vld [vmem:[%s5444_s3 + $0x2c4] ss:$16 sps:$4 sm:$0xff]  }
 0x3e5   :  { %1582 = vmatpush1.bf16.msra.mxu1 %v3878_v8  ;;  %v3965_v8 = vld [vmem:[%s5444_s3 + $0x1c0] ss:$16 sps:$4 sm:$0xff]  }
 0x3e6   :  { %2921 = vmatprep.subr.bf16.mxu1 %v3886_v17  ;;  %2827 = vmatpush1.bf16.msra.mxu0 %v3965_v8  ;;  %v3979_v17 = vld [vmem:[%s5444_s3 + $0x204] ss:$16 sps:$4 sm:$0xff]   ;;  %v4013_v8 = vld [vmem:[%s5444_s3 + $0x2c0] ss:$16 sps:$4 sm:$0xff]  }
 0x3e8   :  { %1584 = vmatmul.mubr.bf16.vlgmr.msra.gmra.mrb[8].mxu1 %v886_v10  ;;  %v3973_v10 = vld [vmem:[%s5444_s3 + $0x1e4] ss:$16 sps:$4 sm:$0xff]  }
 0x3e9   :  { %2922 = vmatpush1.bf16.msra.mxu1 %v3884_v16  ;;  %v3974_v16 = vld [vmem:[%s5444_s3 + $0x1e8] ss:$16 sps:$4 sm:$0xff]   ;;  %2828 = vmatprep.subr.bf16.mxu0 %v3973_v10  ;;  %v4021_v10 = vld [vmem:[%s5444_s3 + $0x2e4] ss:$16 sps:$4 sm:$0xff]  }
 0x3ea   :  { %2923 = vmatprep.subr.bf16.mxu1 %v3892_v19  ;;  %2829 = vmatpush1.bf16.msra.mxu0 %v3971_v14  ;;  %v4019_v14 = vld [vmem:[%s5444_s3 + $0x2e0] ss:$16 sps:$4 sm:$0xff]  }
 0x3eb   :  { %2839 = vmatprep.subr.bf16.mxu0 %v3979_v17  ;;  %v4027_v17 = vld [vmem:[%s5444_s3 + $0x304] ss:$16 sps:$4 sm:$0xff]  }
 0x3ed   :  { %2924 = vmatpush1.bf16.msra.mxu1 %v3890_v21 }
 0x3ee   :  { %2925 = vmatprep.subr.bf16.mxu1 %v3898_v23  ;;  %v3244_v23 = vld [vmem:[%s5445_s4 + $0x20] ss:$8 sm:$0x3] }
 0x3f1   :  { %2926 = vmatpush1.bf16.msra.mxu1 %v3896_v25  ;;  %v1596_v25 = vrot.slane %v3244_v23, %v4700_v13 }
 0x3f2   :  { %2927 = vmatprep.subr.bf16.mxu1 %v3904_v27  ;;  %v1600_v27 = vrot.slane %v3244_v23, %v4706_v15  ;;  %v4031_v23 = vld [vmem:[%s5444_s3 + $0x320] ss:$16 sps:$4 sm:$0xff]  }
 0x3f5   :  { %2928 = vmatpush1.bf16.msra.mxu1 %v3902_v29  ;;  %v1609_v29 = vrot.slane %v3245_v24, %v4700_v13  ;;  %v4034_v24 = vld [vmem:[%s5444_s3 + $0x328] ss:$16 sps:$4 sm:$0xff]  }
 0x3f6   :  { %2929 = vmatprep.subr.bf16.mxu1 %v3910_v31 }
 0x3f9   :  { %2930 = vmatpush1.bf16.msra.mxu1 %v3908_v33 }
 0x3fa   :  { %2931 = vmatprep.subr.bf16.mxu1 %v3916_v35 }
 0x3fd   :  { %2932 = vmatpush1.bf16.msra.mxu1 %v3914_v37 }
 0x3fe   :  { %2933 = vmatprep.subr.bf16.mxu1 %v3922_v39 }
 0x401   :  { %2934 = vmatpush1.bf16.msra.mxu1 %v3920_v41 }
 0x402   :  { %2935 = vmatprep.subr.bf16.mxu1 %v3928_v43 }
 0x405   :  { %2936 = vmatpush1.bf16.msra.mxu1 %v3926_v45  ;;  %v3977_v45 = vld [vmem:[%s5444_s3 + $0x200] ss:$16 sps:$4 sm:$0xff]  }
 0x406   :  { %2937 = vmatprep.subr.bf16.mxu1 %v3934_v47 }
 0x409   :  { %2938 = vmatpush1.bf16.msra.mxu1 %v3932_v49 }
 0x40a   :  { %2939 = vmatprep.subr.bf16.mxu1 %v3940_v51  ;;  %v3988_v51 = vld [vmem:[%s5444_s3 + $0x22c] ss:$16 sps:$4 sm:$0xff]  }
 0x40d   :  { %2940 = vmatpush1.bf16.msra.mxu1 %v3938_v53  ;;  %v3986_v53 = vld [vmem:[%s5444_s3 + $0x228] ss:$16 sps:$4 sm:$0xff]  }
 0x40e   :  { %2941 = vmatprep.subr.bf16.mxu1 %v3946_v55  ;;  %v3994_v55 = vld [vmem:[%s5444_s3 + $0x24c] ss:$16 sps:$4 sm:$0xff]  }
 0x411   :  { %2942 = vmatpush1.bf16.msra.mxu1 %v3944_v57  ;;  %v3992_v57 = vld [vmem:[%s5444_s3 + $0x248] ss:$16 sps:$4 sm:$0xff]  }
 0x412   :  { %2943 = vmatprep.subr.bf16.mxu1 %v3952_v59  ;;  %v4000_v59 = vld [vmem:[%s5444_s3 + $0x26c] ss:$16 sps:$4 sm:$0xff]  }
 0x415   :  { %2944 = vmatpush1.bf16.msra.mxu1 %v3950_v61  ;;  %v3998_v61 = vld [vmem:[%s5444_s3 + $0x268] ss:$16 sps:$4 sm:$0xff]  }
 0x416   :  { %2945 = vmatprep.subr.bf16.mxu1 %v3958_v63  ;;  %v4006_v63 = vld [vmem:[%s5444_s3 + $0x28c] ss:$16 sps:$4 sm:$0xff]  }
 0x419   :  { %2946 = vmatpush1.bf16.msra.mxu1 %v3956_v2  ;;  %v4004_v2 = vld [vmem:[%s5444_s3 + $0x288] ss:$16 sps:$4 sm:$0xff]  }
 0x41a   :  { %2947 = vmatprep.subr.bf16.mxu1 %v3964_v1  ;;  %v4012_v1 = vld [vmem:[%s5444_s3 + $0x2ac] ss:$16 sps:$4 sm:$0xff]  }
 0x41d   :  { %2948 = vmatpush1.bf16.msra.mxu1 %v3962_v5  ;;  %v4010_v5 = vld [vmem:[%s5444_s3 + $0x2a8] ss:$16 sps:$4 sm:$0xff]  }
 0x41e   :  { %2949 = vmatprep.subr.bf16.mxu1 %v3970_v7  ;;  %v4018_v7 = vld [vmem:[%s5444_s3 + $0x2cc] ss:$16 sps:$4 sm:$0xff]  }
 0x421   :  { %2950 = vmatpush1.bf16.msra.mxu1 %v3968_v9  ;;  %v4016_v9 = vld [vmem:[%s5444_s3 + $0x2c8] ss:$16 sps:$4 sm:$0xff]  }
 0x422   :  { %2951 = vmatprep.subr.bf16.mxu1 %v3976_v11  ;;  %v4024_v11 = vld [vmem:[%s5444_s3 + $0x2ec] ss:$16 sps:$4 sm:$0xff]  }
 0x425   :  { %2952 = vmatpush1.bf16.msra.mxu1 %v3974_v16  ;;  %v4022_v16 = vld [vmem:[%s5444_s3 + $0x2e8] ss:$16 sps:$4 sm:$0xff]  }
 0x426   :  { %2962 = vmatprep.subr.bf16.mxu1 %v3982_v18  ;;  %v4030_v18 = vld [vmem:[%s5444_s3 + $0x30c] ss:$16 sps:$4 sm:$0xff]  }
 0x479   :  { %v1503_v19 = vpop.f32.mrb[12].mxu0 }
 0x47a   :  { %v1505_v20 = vpop.f32.mrb[13].mxu0 }
 0x47b   :  { %v1507_v21 = vpop.f32.mrb[14].mxu0 }
 0x47c   :  { %v1508_v22 = vpop.f32.mrb[15].mxu0  ;;  %v4033_v21 = vld [vmem:[%s5444_s3 + $0x324] ss:$16 sps:$4 sm:$0xff]  }
 0x47d   :  { %v4036_v22 = vld [vmem:[%s5444_s3 + $0x32c] ss:$16 sps:$4 sm:$0xff]  }
 0x4bb   :  { %v1585_v26 = vpop.f32.mrb[8].mxu1 }
 0x4bc   :  { %v3621_v28 = vadd.f32 %v1585_v26, %v1503_v19  ;;  %v1587_v30 = vpop.f32.mrb[9].mxu1  ;;  %v4025_v19 = vld [vmem:[%s5444_s3 + $0x300] ss:$16 sps:$4 sm:$0xff]   ;;  %v4042_v26 = vld [vmem:[%s5444_s3 + $0x34c] ss:$16 sps:$4 sm:$0xff]  }
 0x4bd   :  { %v3622_v31 = vadd.f32 %v1587_v30, %v1505_v20  ;;  %v1589_v33 = vpop.f32.mrb[10].mxu1  ;;  %v4028_v20 = vld [vmem:[%s5444_s3 + $0x308] ss:$16 sps:$4 sm:$0xff]   ;;  %v4048_v30 = vld [vmem:[%s5444_s3 + $0x36c] ss:$16 sps:$4 sm:$0xff]  }
 0x4be   :  { %v1603_v34 = vmul.f32 %v3621_v28, %v1596_v25  ;;  %v1590_v35 = vpop.f32.mrb[11].mxu1  ;;  %v4039_v25 = vld [vmem:[%s5444_s3 + $0x344] ss:$16 sps:$4 sm:$0xff]   ;;  %v4040_v28 = vld [vmem:[%s5444_s3 + $0x348] ss:$16 sps:$4 sm:$0xff]  }
 0x4bf   :  { %v1604_v37 = vmul.f32 %v3622_v31, %v1600_v27  ;;  %v4037_v27 = vld [vmem:[%s5444_s3 + $0x340] ss:$16 sps:$4 sm:$0xff]   ;;  %v4051_v33 = vld [vmem:[%s5444_s3 + $0x384] ss:$16 sps:$4 sm:$0xff]  }
 0x4c0   :  { %v1616_v38 = vadd.f32 %v1609_v29, %v1603_v34  ;;  %v4045_v29 = vld [vmem:[%s5444_s3 + $0x364] ss:$16 sps:$4 sm:$0xff]   ;;  %v4043_v31 = vld [vmem:[%s5444_s3 + $0x360] ss:$16 sps:$4 sm:$0xff]   ;;  %v4054_v34 = vld [vmem:[%s5444_s3 + $0x38c] ss:$16 sps:$4 sm:$0xff]  }
 0x4c1   :  { %v1617_v39 = vadd.f32 %v1613_v32, %v1604_v37  ;;  %v4046_v32 = vld [vmem:[%s5444_s3 + $0x368] ss:$16 sps:$4 sm:$0xff]   ;;  %v4049_v35 = vld [vmem:[%s5444_s3 + $0x380] ss:$16 sps:$4 sm:$0xff]   ;;  %v4057_v37 = vld [vmem:[%s5444_s3 + $0x3a4] ss:$16 sps:$4 sm:$0xff]  }
 0x4c2   :  { %vm1618_vm10 = vcmp.gt.f32.partialorder %v1616_v38, 0.0  ;;  %v1621_v40 = vmul.f32 %v1620_v36, %v1616_v38 }
 0x4c3   :  { %v1622_v41 = vmul.f32 %v1620_v36, %v1617_v39  ;;  %vm1619_vm11 = vcmp.gt.f32.partialorder %v1617_v39, 0.0  ;;  %v4052_v36 = vld [vmem:[%s5444_s3 + $0x388] ss:$16 sps:$4 sm:$0xff]  }
 0x4c4   :  { %v5022_v42 = vsel %vm1618_vm10, %v1616_v38, %v1621_v40  ;;  %v4060_v38 = vld [vmem:[%s5444_s3 + $0x3ac] ss:$16 sps:$4 sm:$0xff]   ;;  %v4058_v40 = vld [vmem:[%s5444_s3 + $0x3a8] ss:$16 sps:$4 sm:$0xff]  }
 0x4c5   :  { %v5024_v43 = vsel %vm1619_vm11, %v1617_v39, %v1622_v41  ;;  %v1635_v48 = vpack.c.bf16 %v5022_v42, %v5022_v42  ;;  %v4055_v39 = vld [vmem:[%s5444_s3 + $0x3a0] ss:$16 sps:$4 sm:$0xff]   ;;  %v4063_v41 = vld [vmem:[%s5444_s3 + $0x3c4] ss:$16 sps:$4 sm:$0xff]  }
 0x4c6   :  { %v1636_v44 = vpack.c.bf16 %v5024_v43, %v5024_v43  ;;  %v1628_v47 = vrot.slane %v5024_v43, 1 }
 0x4c8   :  { %2830 = vmatprep.mubr.bf16.mxu0 %v1636_v44  ;;  %2953 = vmatprep.mubr.bf16.mxu1 %v1636_v44  ;;  %v1638_v49 = vpack.c.bf16 %v1628_v47, %v1628_v47  ;;  %v4066_v44 = vld [vmem:[%s5444_s3 + $0x3cc] ss:$16 sps:$4 sm:$0xff]   ;;  %v4069_v47 = vld [vmem:[%s5444_s3 + $0x3e4] ss:$16 sps:$4 sm:$0xff]  }
 0x4c9   :  { %2831 = vmatmul.mubr.bf16.vlgmr.msra.gmra.mrb[16].mxu0 %v1635_v48  ;;  %2954 = vmatmul.mubr.bf16.vlgmr.msra.gmra.mrb[12].mxu1 %v1635_v48  ;;  %v4072_v48 = vld [vmem:[%s5444_s3 + $0x3ec] ss:$16 sps:$4 sm:$0xff]  }
 0x4ca   :  { %2840 = vmatpush1.bf16.msra.mxu0 %v3977_v45  ;;  %2963 = vmatpush1.bf16.msra.mxu1 %v3980_v46  ;;  %v4061_v45 = vld [vmem:[%s5444_s3 + $0x3c0] ss:$16 sps:$4 sm:$0xff]   ;;  %v4064_v46 = vld [vmem:[%s5444_s3 + $0x3c8] ss:$16 sps:$4 sm:$0xff]  }
 0x4cb   :  { %2871 = vmatprep.mubr.bf16.mxu0 %v1638_v49  ;;  %2994 = vmatprep.mubr.bf16.mxu1 %v1638_v49  ;;  %v4067_v49 = vld [vmem:[%s5444_s3 + $0x3e0] ss:$16 sps:$4 sm:$0xff]  }
 0x4cc   :  { %2841 = vmatprep.subr.bf16.mxu0 %v3985_v50  ;;  %2964 = vmatprep.subr.bf16.mxu1 %v3988_v51  ;;  %v4070_v50 = vld [vmem:[%s5444_s3 + $0x3e8] ss:$16 sps:$4 sm:$0xff]   ;;  %v1627_v51 = vrot.slane %v5022_v42, 1 }
 0x4ce   :  { %2842 = vmatpush1.bf16.msra.mxu0 %v3983_v52  ;;  %2965 = vmatpush1.bf16.msra.mxu1 %v3986_v53  ;;  %v4075_v52 = vld [vmem:[%s5444_s3 + $0x404] ss:$16 sps:$4 sm:$0xff]   ;;  %v4078_v53 = vld [vmem:[%s5444_s3 + $0x40c] ss:$16 sps:$4 sm:$0xff]  }
 0x4cf   :  { %2843 = vmatprep.subr.bf16.mxu0 %v3991_v54  ;;  %2966 = vmatprep.subr.bf16.mxu1 %v3994_v55  ;;  %v1632_v54 = vrot.slane %v5024_v43, 2  ;;  %v4073_v55 = vld [vmem:[%s5444_s3 + $0x400] ss:$16 sps:$4 sm:$0xff]   ;;  %v4084_v43 = vld [vmem:[%s5444_s3 + $0x42c] ss:$16 sps:$4 sm:$0xff]  }
 0x4d2   :  { %2844 = vmatpush1.bf16.msra.mxu0 %v3989_v56  ;;  %2967 = vmatpush1.bf16.msra.mxu1 %v3992_v57  ;;  %v1637_v56 = vpack.c.bf16 %v1627_v51, %v1627_v51  ;;  %v4076_v57 = vld [vmem:[%s5444_s3 + $0x408] ss:$16 sps:$4 sm:$0xff]   ;;  %v4159_v51 = vld [vmem:[%s5444_s3 + $0x5c4] ss:$16 sps:$4 sm:$0xff]  }
 0x4d3   :  { %2845 = vmatprep.subr.bf16.mxu0 %v3997_v58  ;;  %2968 = vmatprep.subr.bf16.mxu1 %v4000_v59  ;;  %v1640_v58 = vpack.c.bf16 %v1632_v54, %v1632_v54  ;;  %v4081_v59 = vld [vmem:[%s5444_s3 + $0x424] ss:$16 sps:$4 sm:$0xff]   ;;  %v4160_v54 = vld [vmem:[%s5444_s3 + $0x5c8] ss:$16 sps:$4 sm:$0xff]  }
 0x4d6   :  { %2846 = vmatpush1.bf16.msra.mxu0 %v3995_v60  ;;  %2969 = vmatpush1.bf16.msra.mxu1 %v3998_v61  ;;  %v4079_v60 = vld [vmem:[%s5444_s3 + $0x420] ss:$16 sps:$4 sm:$0xff]   ;;  %v4082_v61 = vld [vmem:[%s5444_s3 + $0x428] ss:$16 sps:$4 sm:$0xff]  }
 0x4d7   :  { %2847 = vmatprep.subr.bf16.mxu0 %v4003_v62  ;;  %2970 = vmatprep.subr.bf16.mxu1 %v4006_v63  ;;  %v4087_v62 = vld [vmem:[%s5444_s3 + $0x444] ss:$16 sps:$4 sm:$0xff]   ;;  %v4090_v63 = vld [vmem:[%s5444_s3 + $0x44c] ss:$16 sps:$4 sm:$0xff]  }
 0x4da   :  { %2848 = vmatpush1.bf16.msra.mxu0 %v4001_v0  ;;  %2971 = vmatpush1.bf16.msra.mxu1 %v4004_v2  ;;  %v4085_v0 = vld [vmem:[%s5444_s3 + $0x440] ss:$16 sps:$4 sm:$0xff]   ;;  %v4088_v2 = vld [vmem:[%s5444_s3 + $0x448] ss:$16 sps:$4 sm:$0xff]  }
 0x4db   :  { %2849 = vmatprep.subr.bf16.mxu0 %v4009_v3  ;;  %2972 = vmatprep.subr.bf16.mxu1 %v4012_v1  ;;  %v4093_v3 = vld [vmem:[%s5444_s3 + $0x464] ss:$16 sps:$4 sm:$0xff]   ;;  %v4096_v1 = vld [vmem:[%s5444_s3 + $0x46c] ss:$16 sps:$4 sm:$0xff]  }
 0x4de   :  { %2850 = vmatpush1.bf16.msra.mxu0 %v4007_v4  ;;  %2973 = vmatpush1.bf16.msra.mxu1 %v4010_v5  ;;  %v4091_v4 = vld [vmem:[%s5444_s3 + $0x460] ss:$16 sps:$4 sm:$0xff]   ;;  %v4094_v5 = vld [vmem:[%s5444_s3 + $0x468] ss:$16 sps:$4 sm:$0xff]  }
 0x4df   :  { %2851 = vmatprep.subr.bf16.mxu0 %v4015_v6  ;;  %2974 = vmatprep.subr.bf16.mxu1 %v4018_v7  ;;  %v4099_v6 = vld [vmem:[%s5444_s3 + $0x484] ss:$16 sps:$4 sm:$0xff]   ;;  %v4102_v7 = vld [vmem:[%s5444_s3 + $0x48c] ss:$16 sps:$4 sm:$0xff]  }
 0x4e2   :  { %2852 = vmatpush1.bf16.msra.mxu0 %v4013_v8  ;;  %2975 = vmatpush1.bf16.msra.mxu1 %v4016_v9  ;;  %v4097_v8 = vld [vmem:[%s5444_s3 + $0x480] ss:$16 sps:$4 sm:$0xff]   ;;  %v4100_v9 = vld [vmem:[%s5444_s3 + $0x488] ss:$16 sps:$4 sm:$0xff]  }
 0x4e3   :  { %2853 = vmatprep.subr.bf16.mxu0 %v4021_v10  ;;  %2976 = vmatprep.subr.bf16.mxu1 %v4024_v11  ;;  %v4105_v10 = vld [vmem:[%s5444_s3 + $0x4a4] ss:$16 sps:$4 sm:$0xff]   ;;  %v4108_v11 = vld [vmem:[%s5444_s3 + $0x4ac] ss:$16 sps:$4 sm:$0xff]  }
 0x4e6   :  { %2854 = vmatpush1.bf16.msra.mxu0 %v4019_v14  ;;  %2977 = vmatpush1.bf16.msra.mxu1 %v4022_v16  ;;  %v4103_v14 = vld [vmem:[%s5444_s3 + $0x4a0] ss:$16 sps:$4 sm:$0xff]   ;;  %v4106_v16 = vld [vmem:[%s5444_s3 + $0x4a8] ss:$16 sps:$4 sm:$0xff]  }
 0x4e7   :  { %2855 = vmatprep.subr.bf16.mxu0 %v4027_v17  ;;  %2978 = vmatprep.subr.bf16.mxu1 %v4030_v18  ;;  %v4111_v17 = vld [vmem:[%s5444_s3 + $0x4c4] ss:$16 sps:$4 sm:$0xff]   ;;  %v4114_v18 = vld [vmem:[%s5444_s3 + $0x4cc] ss:$16 sps:$4 sm:$0xff]  }
 0x4ea   :  { %2856 = vmatpush1.bf16.msra.mxu0 %v4025_v19  ;;  %2979 = vmatpush1.bf16.msra.mxu1 %v4028_v20  ;;  %v4109_v19 = vld [vmem:[%s5444_s3 + $0x4c0] ss:$16 sps:$4 sm:$0xff]   ;;  %v4112_v20 = vld [vmem:[%s5444_s3 + $0x4c8] ss:$16 sps:$4 sm:$0xff]  }
 0x4eb   :  { %2857 = vmatprep.subr.bf16.mxu0 %v4033_v21  ;;  %2980 = vmatprep.subr.bf16.mxu1 %v4036_v22  ;;  %v4117_v21 = vld [vmem:[%s5444_s3 + $0x4e4] ss:$16 sps:$4 sm:$0xff]   ;;  %v4120_v22 = vld [vmem:[%s5444_s3 + $0x4ec] ss:$16 sps:$4 sm:$0xff]  }
 0x4ee   :  { %2858 = vmatpush1.bf16.msra.mxu0 %v4031_v23  ;;  %2981 = vmatpush1.bf16.msra.mxu1 %v4034_v24  ;;  %v4115_v23 = vld [vmem:[%s5444_s3 + $0x4e0] ss:$16 sps:$4 sm:$0xff]   ;;  %v4118_v24 = vld [vmem:[%s5444_s3 + $0x4e8] ss:$16 sps:$4 sm:$0xff]  }
 0x4ef   :  { %2859 = vmatprep.subr.bf16.mxu0 %v4039_v25  ;;  %2982 = vmatprep.subr.bf16.mxu1 %v4042_v26  ;;  %v4123_v25 = vld [vmem:[%s5444_s3 + $0x504] ss:$16 sps:$4 sm:$0xff]   ;;  %v4126_v26 = vld [vmem:[%s5444_s3 + $0x50c] ss:$16 sps:$4 sm:$0xff]  }
 0x4f2   :  { %2860 = vmatpush1.bf16.msra.mxu0 %v4037_v27  ;;  %2983 = vmatpush1.bf16.msra.mxu1 %v4040_v28  ;;  %v4121_v27 = vld [vmem:[%s5444_s3 + $0x500] ss:$16 sps:$4 sm:$0xff]   ;;  %v4124_v28 = vld [vmem:[%s5444_s3 + $0x508] ss:$16 sps:$4 sm:$0xff]  }
 0x4f3   :  { %2861 = vmatprep.subr.bf16.mxu0 %v4045_v29  ;;  %2984 = vmatprep.subr.bf16.mxu1 %v4048_v30  ;;  %v4129_v29 = vld [vmem:[%s5444_s3 + $0x524] ss:$16 sps:$4 sm:$0xff]   ;;  %v4132_v30 = vld [vmem:[%s5444_s3 + $0x52c] ss:$16 sps:$4 sm:$0xff]  }
 0x4f6   :  { %2862 = vmatpush1.bf16.msra.mxu0 %v4043_v31  ;;  %2985 = vmatpush1.bf16.msra.mxu1 %v4046_v32  ;;  %v4127_v31 = vld [vmem:[%s5444_s3 + $0x520] ss:$16 sps:$4 sm:$0xff]   ;;  %v4130_v32 = vld [vmem:[%s5444_s3 + $0x528] ss:$16 sps:$4 sm:$0xff]  }
 0x4f7   :  { %2863 = vmatprep.subr.bf16.mxu0 %v4051_v33  ;;  %2986 = vmatprep.subr.bf16.mxu1 %v4054_v34  ;;  %v4135_v33 = vld [vmem:[%s5444_s3 + $0x544] ss:$16 sps:$4 sm:$0xff]   ;;  %v4138_v34 = vld [vmem:[%s5444_s3 + $0x54c] ss:$16 sps:$4 sm:$0xff]  }
 0x4fa   :  { %2864 = vmatpush1.bf16.msra.mxu0 %v4049_v35  ;;  %2987 = vmatpush1.bf16.msra.mxu1 %v4052_v36  ;;  %v4133_v35 = vld [vmem:[%s5444_s3 + $0x540] ss:$16 sps:$4 sm:$0xff]   ;;  %v4136_v36 = vld [vmem:[%s5444_s3 + $0x548] ss:$16 sps:$4 sm:$0xff]  }
 0x4fb   :  { %2865 = vmatprep.subr.bf16.mxu0 %v4057_v37  ;;  %2988 = vmatprep.subr.bf16.mxu1 %v4060_v38  ;;  %v4141_v37 = vld [vmem:[%s5444_s3 + $0x564] ss:$16 sps:$4 sm:$0xff]   ;;  %v4144_v38 = vld [vmem:[%s5444_s3 + $0x56c] ss:$16 sps:$4 sm:$0xff]  }
 0x4fe   :  { %2866 = vmatpush1.bf16.msra.mxu0 %v4055_v39  ;;  %2989 = vmatpush1.bf16.msra.mxu1 %v4058_v40  ;;  %v4139_v39 = vld [vmem:[%s5444_s3 + $0x560] ss:$16 sps:$4 sm:$0xff]   ;;  %v4142_v40 = vld [vmem:[%s5444_s3 + $0x568] ss:$16 sps:$4 sm:$0xff]  }
 0x4ff   :  { %2867 = vmatprep.subr.bf16.mxu0 %v4063_v41  ;;  %2990 = vmatprep.subr.bf16.mxu1 %v4066_v44  ;;  %v4147_v41 = vld [vmem:[%s5444_s3 + $0x584] ss:$16 sps:$4 sm:$0xff]   ;;  %v4150_v44 = vld [vmem:[%s5444_s3 + $0x58c] ss:$16 sps:$4 sm:$0xff]  }
 0x502   :  { %2868 = vmatpush1.bf16.msra.mxu0 %v4061_v45  ;;  %2991 = vmatpush1.bf16.msra.mxu1 %v4064_v46  ;;  %v4145_v45 = vld [vmem:[%s5444_s3 + $0x580] ss:$16 sps:$4 sm:$0xff]   ;;  %v4148_v46 = vld [vmem:[%s5444_s3 + $0x588] ss:$16 sps:$4 sm:$0xff]  }
 0x503   :  { %2869 = vmatprep.subr.bf16.mxu0 %v4069_v47  ;;  %2992 = vmatprep.subr.bf16.mxu1 %v4072_v48  ;;  %v4153_v47 = vld [vmem:[%s5444_s3 + $0x5a4] ss:$16 sps:$4 sm:$0xff]   ;;  %v4156_v48 = vld [vmem:[%s5444_s3 + $0x5ac] ss:$16 sps:$4 sm:$0xff]  }
 0x506   :  { %2870 = vmatpush1.bf16.msra.mxu0 %v4067_v49  ;;  %2993 = vmatpush1.bf16.msra.mxu1 %v4070_v50  ;;  %v4151_v49 = vld [vmem:[%s5444_s3 + $0x5a0] ss:$16 sps:$4 sm:$0xff]   ;;  %v4154_v50 = vld [vmem:[%s5444_s3 + $0x5a8] ss:$16 sps:$4 sm:$0xff]  }
 0x507   :  { %2880 = vmatprep.subr.bf16.mxu0 %v4075_v52  ;;  %3003 = vmatprep.subr.bf16.mxu1 %v4078_v53  ;;  %v4162_v52 = vld [vmem:[%s5444_s3 + $0x5cc] ss:$16 sps:$4 sm:$0xff]   ;;  %v4157_v53 = vld [vmem:[%s5444_s3 + $0x5c0] ss:$16 sps:$4 sm:$0xff]  }
 0x509   :  { %2872 = vmatmul.mubr.bf16.vlgmr.msra.gmra.mrb[16].mxu0 %v1637_v56  ;;  %2995 = vmatmul.mubr.bf16.vlgmr.msra.gmra.mrb[12].mxu1 %v1637_v56  ;;  %v4168_v56 = vld [vmem:[%s5444_s3 + $0x5ec] ss:$16 sps:$4 sm:$0xff]  }
 0x50a   :  { %2881 = vmatpush1.bf16.msra.mxu0 %v4073_v55  ;;  %2912 = vmatprep.mubr.bf16.mxu0 %v1640_v58  ;;  %v4165_v55 = vld [vmem:[%s5444_s3 + $0x5e4] ss:$16 sps:$4 sm:$0xff]  }
 0x50b   :  { %3004 = vmatpush1.bf16.msra.mxu1 %v4076_v57  ;;  %3035 = vmatprep.mubr.bf16.mxu1 %v1640_v58  ;;  %v4163_v57 = vld [vmem:[%s5444_s3 + $0x5e0] ss:$16 sps:$4 sm:$0xff]   ;;  %v4166_v58 = vld [vmem:[%s5444_s3 + $0x5e8] ss:$16 sps:$4 sm:$0xff]  }
 0x50c   :  { %2882 = vmatprep.subr.bf16.mxu0 %v4081_v59  ;;  %3005 = vmatprep.subr.bf16.mxu1 %v4084_v43  ;;  %v1631_v59 = vrot.slane %v5022_v42, 2 }
 0x50e   :  { %2883 = vmatpush1.bf16.msra.mxu0 %v4079_v60  ;;  %v1639_v43 = vpack.c.bf16 %v1631_v59, %v1631_v59  ;;  %v3343_v60 = vld [vmem:[%s5445_s4 + $0x22] ss:$8 sm:$0xf] }
 0x50f   :  { %3006 = vmatpush1.bf16.msra.mxu1 %v4082_v61  ;;  %2884 = vmatprep.subr.bf16.mxu0 %v4087_v62  ;;  %v3055_v61 = vsub.s32 2, %v4697_v12  ;;  %v3059_v62 = vsub.s32 3, %v4697_v12  ;;  %v3048_v42 = vrot.slane %v3343_v60, %v4700_v13  ;;  %v3538_v12 = vld [vmem:[%s5445_s4 + $0x24] ss:$8 sm:$0xf] }
 0x510   :  { %3007 = vmatprep.subr.bf16.mxu1 %v4090_v63  ;;  %v3344_v63 = vld [vmem:[%s5445_s4 + $0x23] ss:$8 sm:$0xf]  ;;  %s3539_s4 = sld [smem:[#allocation3 + $0x6]] }
 0x512   :  { %2885 = vmatpush1.bf16.msra.mxu0 %v4085_v0  ;;  %v3056_v0 = vrot.slane %v3343_v60, %v3055_v61 }
 0x513   :  { %3008 = vmatpush1.bf16.msra.mxu1 %v4088_v2  ;;  %2886 = vmatprep.subr.bf16.mxu0 %v4093_v3  ;;  %v3052_v2 = vrot.slane %v3343_v60, %v4706_v15  ;;  %v3073_v3 = vrot.slane %v3344_v63, %v4700_v13 }
 0x514   :  { %3009 = vmatprep.subr.bf16.mxu1 %v4096_v1  ;;  %v3060_v1 = vrot.slane %v3343_v60, %v3059_v62 }
 0x516   :  { %2887 = vmatpush1.bf16.msra.mxu0 %v4091_v4 }
 0x517   :  { %3010 = vmatpush1.bf16.msra.mxu1 %v4094_v5  ;;  %2888 = vmatprep.subr.bf16.mxu0 %v4099_v6  ;;  %v3081_v5 = vrot.slane %v3344_v63, %v3055_v61  ;;  %v3077_v6 = vrot.slane %v3344_v63, %v4706_v15 }
 0x518   :  { %3011 = vmatprep.subr.bf16.mxu1 %v4102_v7 }
 0x51a   :  { %2889 = vmatpush1.bf16.msra.mxu0 %v4097_v8 }
 0x51b   :  { %3012 = vmatpush1.bf16.msra.mxu1 %v4100_v9  ;;  %2890 = vmatprep.subr.bf16.mxu0 %v4105_v10  ;;  %v3085_v10 = vrot.slane %v3344_v63, %v3059_v62 }
 0x51c   :  { %3013 = vmatprep.subr.bf16.mxu1 %v4108_v11  ;;  %v3098_v11 = vstv %s3345_s11 }
 0x51e   :  { %2891 = vmatpush1.bf16.msra.mxu0 %v4103_v14 }
 0x51f   :  { %3014 = vmatpush1.bf16.msra.mxu1 %v4106_v16  ;;  %2892 = vmatprep.subr.bf16.mxu0 %v4111_v17 }
 0x520   :  { %3015 = vmatprep.subr.bf16.mxu1 %v4114_v18 }
 0x522   :  { %2893 = vmatpush1.bf16.msra.mxu0 %v4109_v19 }
 0x523   :  { %3016 = vmatpush1.bf16.msra.mxu1 %v4112_v20  ;;  %2894 = vmatprep.subr.bf16.mxu0 %v4117_v21 }
 0x524   :  { %3017 = vmatprep.subr.bf16.mxu1 %v4120_v22 }
 0x526   :  { %2895 = vmatpush1.bf16.msra.mxu0 %v4115_v23  ;;  %v3113_v23 = vrot.slane %v3538_v12, %v4700_v13 }
 0x527   :  { %3018 = vmatpush1.bf16.msra.mxu1 %v4118_v24  ;;  %2896 = vmatprep.subr.bf16.mxu0 %v4123_v25 }
 0x528   :  { %3019 = vmatprep.subr.bf16.mxu1 %v4126_v26 }
 0x52a   :  { %2897 = vmatpush1.bf16.msra.mxu0 %v4121_v27  ;;  %v3117_v27 = vrot.slane %v3538_v12, %v4706_v15 }
 0x52b   :  { %3020 = vmatpush1.bf16.msra.mxu1 %v4124_v28  ;;  %2898 = vmatprep.subr.bf16.mxu0 %v4129_v29  ;;  %v3121_v28 = vrot.slane %v3538_v12, %v3055_v61 }
 0x52c   :  { %3021 = vmatprep.subr.bf16.mxu1 %v4132_v30 }
 0x52e   :  { %2899 = vmatpush1.bf16.msra.mxu0 %v4127_v31  ;;  %v3125_v31 = vrot.slane %v3538_v12, %v3059_v62 }
 0x52f   :  { %3022 = vmatpush1.bf16.msra.mxu1 %v4130_v32  ;;  %2900 = vmatprep.subr.bf16.mxu0 %v4135_v33 }
 0x530   :  { %3023 = vmatprep.subr.bf16.mxu1 %v4138_v34 }
 0x532   :  { %2901 = vmatpush1.bf16.msra.mxu0 %v4133_v35 }
 0x533   :  { %3024 = vmatpush1.bf16.msra.mxu1 %v4136_v36  ;;  %2902 = vmatprep.subr.bf16.mxu0 %v4141_v37 }
 0x534   :  { %3025 = vmatprep.subr.bf16.mxu1 %v4144_v38 }
 0x536   :  { %2903 = vmatpush1.bf16.msra.mxu0 %v4139_v39 }
 0x537   :  { %3026 = vmatpush1.bf16.msra.mxu1 %v4142_v40  ;;  %2904 = vmatprep.subr.bf16.mxu0 %v4147_v41 }
 0x538   :  { %3027 = vmatprep.subr.bf16.mxu1 %v4150_v44 }
 0x53a   :  { %2905 = vmatpush1.bf16.msra.mxu0 %v4145_v45 }
 0x53b   :  { %3028 = vmatpush1.bf16.msra.mxu1 %v4148_v46  ;;  %2906 = vmatprep.subr.bf16.mxu0 %v4153_v47 }
 0x53c   :  { %3029 = vmatprep.subr.bf16.mxu1 %v4156_v48 }
 0x53e   :  { %2907 = vmatpush1.bf16.msra.mxu0 %v4151_v49 }
 0x53f   :  { %3030 = vmatpush1.bf16.msra.mxu1 %v4154_v50  ;;  %2908 = vmatprep.subr.bf16.mxu0 %v4159_v51  ;;  %v3145_v50 = vstv %s3539_s4 }
 0x540   :  { %3031 = vmatprep.subr.bf16.mxu1 %v4162_v52 }
 0x542   :  { %2909 = vmatpush1.bf16.msra.mxu0 %v4157_v53 }
 0x543   :  { %3032 = vmatpush1.bf16.msra.mxu1 %v4160_v54  ;;  %2910 = vmatprep.subr.bf16.mxu0 %v4165_v55 }
 0x544   :  { %3033 = vmatprep.subr.bf16.mxu1 %v4168_v56 }
 0x546   :  { %2911 = vmatpush1.bf16.msra.mxu0 %v4163_v57 }
 0x547   :  { %3034 = vmatpush1.bf16.msra.mxu1 %v4166_v58 }
 0x549   :  { %2913 = vmatmul.mubr.bf16.vlgmr.msra.gmra.mrb[16].mxu0 %v1639_v43 }
 0x54a   :  { %3036 = vmatmul.mubr.bf16.vlgmr.msra.gmra.mrb[12].mxu1 %v1639_v43 }
 0x61c   :  { %v2914_v4 = vpop.f32.mrb[16].mxu0 }
 0x61d   :  { %v3065_v7 = vmul.f32 %v3048_v42, %v2914_v4  ;;  %v3037_v8 = vpop.f32.mrb[12].mxu1  ;;  %v2916_v9 = vpop.f32.mrb[17].mxu0 }
 0x61e   :  { %v3067_v14 = vmul.f32 %v3056_v0, %v3037_v8  ;;  %v3066_v16 = vmul.f32 %v3052_v2, %v2916_v9  ;;  %v3039_v17 = vpop.f32.mrb[13].mxu1  ;;  %v2918_v18 = vpop.f32.mrb[18].mxu0 }
 0x61f   :  { %v3090_v19 = vadd.f32 %v3073_v3, %v3065_v7  ;;  %v3068_v20 = vmul.f32 %v3060_v1, %v3039_v17  ;;  %v3041_v21 = vpop.f32.mrb[14].mxu1  ;;  %v2919_v22 = vpop.f32.mrb[19].mxu0 }
 0x620   :  { %v3092_v24 = vadd.f32 %v3081_v5, %v3067_v14  ;;  %v3091_v25 = vadd.f32 %v3077_v6, %v3066_v16  ;;  %v3042_v26 = vpop.f32.mrb[15].mxu1 }
 0x621   :  { %vm3094_vm12 = vcmp.gt.f32.partialorder %v3090_v19, 0.0  ;;  %v3099_v29 = vmul.f32 %v3098_v11, %v3090_v19  ;;  %v3093_v30 = vadd.f32 %v3085_v10, %v3068_v20 }
 0x622   :  { %vm3096_vm13 = vcmp.gt.f32.partialorder %v3092_v24, 0.0  ;;  %v3101_v32 = vmul.f32 %v3098_v11, %v3092_v24  ;;  %vm3095_vm14 = vcmp.gt.f32.partialorder %v3091_v25, 0.0  ;;  %v3100_v33 = vmul.f32 %v3098_v11, %v3091_v25 }
 0x623   :  { %v3103_v34 = vsel %vm3094_vm12, %v3090_v19, %v3099_v29  ;;  %v3102_v35 = vmul.f32 %v3098_v11, %v3093_v30  ;;  %vm3097_vm15 = vcmp.gt.f32.partialorder %v3093_v30, 0.0 }
 0x624   :  { %v3104_v36 = vsel %vm3095_vm14, %v3091_v25, %v3100_v33  ;;  %v3105_v13 = vsel %vm3096_vm13, %v3092_v24, %v3101_v32  ;;  %v3130_v37 = vmul.f32 %v3113_v23, %v3103_v34 }
 0x625   :  { %v3106_v38 = vsel %vm3097_vm15, %v3093_v30, %v3102_v35  ;;  %v3131_v39 = vmul.f32 %v3117_v27, %v3104_v36  ;;  %v3132_v40 = vmul.f32 %v3121_v28, %v3105_v13 }
 0x626   :  { %v3135_v15 = vsel %vm3134_vm0, %v3130_v37, 0.0  ;;  %v3133_v41 = vmul.f32 %v3125_v31, %v3106_v38 }
 0x627   :  { %v3136_v44 = vsel %vm3134_vm0, %v3131_v39, 0.0  ;;  %v3138_v46 = vsel %vm3134_vm0, %v3132_v40, 0.0 }
 0x628   :  { %v3137_v45 = vadd.f32 %v3136_v44, %v3135_v15  ;;  %v3140_v48 = vsel %vm3134_vm0, %v3133_v41, 0.0 }
 0x62a   :  { %v3139_v47 = vadd.f32 %v3138_v46, %v3137_v45 }
 0x62c   :  { %v3141_v49 = vadd.f32 %v3140_v48, %v3139_v47 }
 0x62e   :  { %3142 = vadd.xlane.f32.xlu0 %v3141_v49 }
 0x6bb   :  { %v3143_v51 = vpop.xlane.xlu0 %3142 }
 0x6bc   :  { %v3146_v52 = vadd.f32 %v3145_v50, %v3143_v51 }
 0x6be   :  { %3148 = vst.msk [vmem:[#allocation6] sm:$0x1] %vm3147_vm1, %v3146_v52 }
 0x6bf   :  { %4192 = shalt.err (!%p4189_p9)
}
 0x6c0   :  { %s4193_s19 = scalar_lea.hbm %s5447_s6, 16 }
 0x6c1   :  { %p4194_p10 = scmp.ne.s32.totalorder %s5447_s6, %s4193_s19  ;;  %p4197_p11 = scmp.lt.u32.totalorder %s4193_s19, %s5447_s6 }
 0x6c3   :  { %p4199_p12 = pnand %p4197_p11, %p4194_p10 }
 0x6c5   :  { %4202 = shalt.err (!%p4199_p12)
}
 0x6c6   :  { %3158 = dma.vmem_to_hbm [thread:$0]  %s3156_s16, 16, %s5447_s6, [#allocation4]  }
 0x6c7   :  { %4205 = dma.done.wait [#allocation4], 16  }
 0x6c8   :  { %4206 = vsyncadd [#allocation4], 4294967280 }
 0x6c9   :  { %3162 = vsyncpa [#allocation4], 1 }
 0x6ca   :  { %3163 = vsyncpa [#allocation5], 1 }

</bundles_post_ra>
